<compile_context>
chip_gen: v6e
topology: v6e:2x2x1
jax: 0.10.0
libtpu: 0.0.40
codegen_flags: <defaults>
</compile_context>

<pallas_src>
import jax
import jax.numpy as jnp
from jax import lax
from jax.experimental import pallas as pl
from jax.experimental.pallas import tpu as pltpu


_PAD_MODE = {
    "reflection": "reflect",
    "zero": "constant",
    "replication": "edge",
    "circular": "wrap",
}


def _pad_amounts(l):
    # (left, right, top, bottom), matching the PyTorch module.
    if l % 2 == 1:
        p = l // 2
        return p, p, p, p
    return l // 2, l // 2 - 1, l // 2, l // 2 - 1


def _vmem_limit_bytes():
    # Per-generation VMEM ceiling instead of a hard-coded budget:
    #   v5e/v6e: 128 MiB physical -> 96 MiB limit; v7x: 64 MiB -> 48 MiB.
    try:
        cap = int(pltpu.get_tpu_info().vmem_capacity_bytes)
    except Exception:
        cap = 64 * 1024 * 1024
    return int(min(cap * 3 // 4, 96 * 1024 * 1024))


def _make_blur_kernel(l, H, W):
    def kernel(x_ref, m_ref, o_ref):
        # x_ref: (1, H_p, W_p)    one padded plane (W in the lane axis)
        # m_ref: (1, l, W_p, W)   f32 banded conv-as-matmul matrices, one per ki
        # o_ref: (1, H, W)
        acc = jnp.zeros((H, W), jnp.float32)
        # Fully unrolled ki loop (LLO sees the whole loop); register accumulator,
        # single output store at the end.
        for ki in range(l):
            band = x_ref[0, ki:ki + H, :].astype(jnp.float32)     # (H, W_p)
            m_ki = m_ref[0, ki, :, :]                              # (W_p, W) f32
            acc = acc + jnp.dot(band, m_ki,
                                preferred_element_type=jnp.float32,
                                precision=lax.Precision.HIGHEST)
        o_ref[0, :, :] = acc.astype(o_ref.dtype)

    return kernel


def _banded_matrices(kernel, l, W_p, W, C=None):
    """Banded matrices M with M[..., ki, j, w] = k[..., ki, j-w] if 0<=j-w<l else 0.

    out[h, w] = sum_ki (x_pad[h+ki, :] @ M[ki])[w] reproduces the l x l
    cross-correlation of F.conv2d on the padded plane.
    """
    j = jnp.arange(W_p)[:, None]               # (W_p, 1)
    w = jnp.arange(W)[None, :]                 # (1, W)
    kj = j - w                                 # (W_p, W)
    valid = (kj >= 0) & (kj < l)
    kj_c = jnp.clip(kj, 0, l - 1)
    k32 = kernel.astype(jnp.float32)           # keep taps in f32 (even for bf16 x)
    if kernel.ndim == 2:
        m = jnp.where(valid[None], k32[:, kj_c], 0.0)              # (l, W_p, W)
        return m[None]                                             # (1, l, W_p, W)
    # (B, l, l) per-batch kernels -> per-plane matrices, plane g = b*C + c.
    kbc = jnp.repeat(k32, C, axis=0)                               # (B*C, l, l)
    return jnp.where(valid[None, None], kbc[:, :, kj_c], 0.0)      # (B*C, l, W_p, W)


def batch_blur(x, kernel, l=15, padmode="reflection"):
    """Pallas equivalent of BatchBlur.forward(input, kernel).

    x:      (B, C, H, W)
    kernel: (l, l) shared blur kernel, or (B, l, l) per-batch kernels.
    """
    B, C, H, W = x.shape
    BC = B * C
    assert padmode in _PAD_MODE, f"unsupported padmode {padmode}"
    p_left, p_right, p_top, p_bottom = _pad_amounts(l)
    H_p, W_p = H + p_top + p_bottom, W + p_left + p_right

    # Pad in NCHW, then a free leading-dim reshape to (B*C, H_p, W_p): W stays
    # in the lane axis, no transposes before or after the kernel.
    xpad = jnp.pad(x, ((0, 0), (0, 0), (p_top, p_bottom), (p_left, p_right)),
                   mode=_PAD_MODE[padmode]).reshape(BC, H_p, W_p)

    if kernel.ndim == 2:
        m = _banded_matrices(kernel, l, W_p, W)               # (1, l, W_p, W)
        m_map = lambda g: (0, 0, 0, 0)                        # same block every step
    elif kernel.ndim == 3:
        m = _banded_matrices(kernel, l, W_p, W, C=C)          # (BC, l, W_p, W)
        m_map = lambda g: (g, 0, 0, 0)                        # per-plane matrices
    else:
        raise ValueError("kernel must be (l, l) or (B, l, l)")

    itemsize = jnp.dtype(x.dtype).itemsize
    out = pl.pallas_call(
        _make_blur_kernel(l, H, W),
        out_shape=jax.ShapeDtypeStruct((BC, H, W), x.dtype),
        grid_spec=pltpu.PrefetchScalarGridSpec(
            num_scalar_prefetch=0,
            grid=(BC,),
            in_specs=[
                pl.BlockSpec((1, H_p, W_p), lambda g: (g, 0, 0)),
                pl.BlockSpec((1, l, W_p, W), m_map),
            ],
            out_specs=pl.BlockSpec((1, H, W), lambda g: (g, 0, 0)),
        ),
        compiler_params=pltpu.CompilerParams(
            dimension_semantics=("parallel",),
            vmem_limit_bytes=_vmem_limit_bytes(),
        ),
        cost_estimate=pl.CostEstimate(
            flops=2 * BC * l * H * W_p * W,
            transcendentals=0,
            bytes_accessed=int(xpad.size * itemsize + m.size * 4
                               + BC * H * W * itemsize),
        ),
    )(xpad, m)

    # Free leading-dim reshape back to NCHW.
    return out.reshape(B, C, H, W)


def reference_batch_blur(x, kernel, l=15, padmode="reflection"):
    """Pure-JAX reference (lax.conv) mirroring the torch forward exactly."""
    B, C, H, W = x.shape
    p_left, p_right, p_top, p_bottom = _pad_amounts(l)
    xpad = jnp.pad(x, ((0, 0), (0, 0), (p_top, p_bottom), (p_left, p_right)),
                   mode=_PAD_MODE[padmode])
    H_p, W_p = H + p_top + p_bottom, W + p_left + p_right
    if kernel.ndim == 2:
        lhs = xpad.reshape(B * C, 1, H_p, W_p)
        rhs = kernel.reshape(1, 1, l, l)
        out = lax.conv_general_dilated(
            lhs, rhs, (1, 1), "VALID",
            dimension_numbers=("NCHW", "OIHW", "NCHW"),
            precision=lax.Precision.HIGHEST)
        return out.reshape(B, C, H, W)
    lhs = xpad.reshape(1, B * C, H_p, W_p)
    rhs = jnp.repeat(kernel.reshape(B, 1, l, l), C, axis=0)   # (B*C, 1, l, l)
    out = lax.conv_general_dilated(
        lhs, rhs, (1, 1), "VALID",
        dimension_numbers=("NCHW", "OIHW", "NCHW"),
        feature_group_count=B * C,
        precision=lax.Precision.HIGHEST)
    return out.reshape(B, C, H, W)


if __name__ == "__main__":
    key = jax.random.PRNGKey(0)
    B, C, H, W = 2, 4, 16, 16
    l = 15  # module default; reflection pad of l//2 = 7 on each side

    k_x, k_2d, k_b = jax.random.split(key, 3)
    x = jax.random.normal(k_x, (B, C, H, W), dtype=jnp.float32)

    # Shared 2D blur kernel (normalized, like a real blur kernel).
    kern2d = jax.random.uniform(k_2d, (l, l), dtype=jnp.float32)
    kern2d = kern2d / jnp.sum(kern2d)

    # Per-batch blur kernels (grouped-conv path of the module).
    kernb = jax.random.uniform(k_b, (B, l, l), dtype=jnp.float32)
    kernb = kernb / jnp.sum(kernb, axis=(1, 2), keepdims=True)

    # Path 1: shared (l, l) kernel.
    out2d = jax.block_until_ready(batch_blur(x, kern2d, l=l, padmode="reflection"))
    ref2d = reference_batch_blur(x, kern2d, l=l, padmode="reflection")
    assert out2d.shape == (B, C, H, W) and out2d.dtype == x.dtype
    assert jnp.allclose(out2d, ref2d, rtol=1e-3, atol=1e-3), "mismatch (shared kernel path)"

    # Path 2: per-batch (B, l, l) kernels.
    outb = jax.block_until_ready(batch_blur(x, kernb, l=l, padmode="reflection"))
    refb = reference_batch_blur(x, kernb, l=l, padmode="reflection")
    assert outb.shape == (B, C, H, W) and outb.dtype == x.dtype
    assert jnp.allclose(outb, refb, rtol=1e-3, atol=1e-3), "mismatch (per-batch kernel path)"

    print("KERNEL_OK")
</pallas_src>

<mosaic_0001>
module attributes {stable_mosaic.version = 11 : i64} {
  func.func @kernel(%arg0: i32, %arg1: memref<1x30x30xf32, #tpu.memory_space<vmem>>, %arg2: memref<1x15x30x16xf32, #tpu.memory_space<vmem>>, %arg3: memref<1x16x16xf32, #tpu.memory_space<vmem>>) attributes {dimension_semantics = [#tpu.dimension_semantics<parallel>], iteration_bounds = array<i64: 8>, scalar_prefetch = 0 : i64, scratch_operands = 0 : i64, tpu.core_type = #tpu.core_type<tc>, window_params = [{transform_indices = @transform_0, window_bounds = array<i64: 1, 30, 30>}, {pipeline_mode = #tpu.pipeline_mode<synchronous>, transform_indices = @transform_1, window_bounds = array<i64: 1, 15, 30, 16>}, {transform_indices = @transform_2, window_bounds = array<i64: 1, 16, 16>}]} {
    %cst = arith.constant 0.000000e+00 : f32
    %0 = vector.broadcast %cst : f32 to vector<16x16xf32>
    %c0 = arith.constant 0 : index
    %c0_0 = arith.constant 0 : index
    %c0_1 = arith.constant 0 : index
    %1 = vector.load %arg1[%c0, %c0_0, %c0_1] : memref<1x30x30xf32, #tpu.memory_space<vmem>>, vector<1x16x30xf32>
    %2 = vector.shape_cast %1 : vector<1x16x30xf32> to vector<16x30xf32>
    %c0_2 = arith.constant 0 : index
    %c0_3 = arith.constant 0 : index
    %c0_4 = arith.constant 0 : index
    %c0_5 = arith.constant 0 : index
    %3 = vector.load %arg2[%c0_2, %c0_3, %c0_4, %c0_5] : memref<1x15x30x16xf32, #tpu.memory_space<vmem>>, vector<1x1x30x16xf32>
    %4 = vector.shape_cast %3 : vector<1x1x30x16xf32> to vector<30x16xf32>
    %cst_6 = arith.constant dense<0.000000e+00> : vector<16x16xf32>
    %5 = tpu.matmul %2, %4, %cst_6 {dimension_numbers = #tpu.dot_dimension_numbers<[1], [0], [0], [1], [0, 0, 1, 1], [], []>, precision = #tpu.contract_precision<fp32>} : vector<16x30xf32>, vector<30x16xf32>, vector<16x16xf32> -> vector<16x16xf32>
    %6 = arith.addf %0, %5 : vector<16x16xf32>
    %c0_7 = arith.constant 0 : index
    %c1 = arith.constant 1 : index
    %c0_8 = arith.constant 0 : index
    %7 = vector.load %arg1[%c0_7, %c1, %c0_8] : memref<1x30x30xf32, #tpu.memory_space<vmem>>, vector<1x16x30xf32>
    %8 = vector.shape_cast %7 : vector<1x16x30xf32> to vector<16x30xf32>
    %c0_9 = arith.constant 0 : index
    %c1_10 = arith.constant 1 : index
    %c0_11 = arith.constant 0 : index
    %c0_12 = arith.constant 0 : index
    %9 = vector.load %arg2[%c0_9, %c1_10, %c0_11, %c0_12] : memref<1x15x30x16xf32, #tpu.memory_space<vmem>>, vector<1x1x30x16xf32>
    %10 = vector.shape_cast %9 : vector<1x1x30x16xf32> to vector<30x16xf32>
    %cst_13 = arith.constant dense<0.000000e+00> : vector<16x16xf32>
    %11 = tpu.matmul %8, %10, %cst_13 {dimension_numbers = #tpu.dot_dimension_numbers<[1], [0], [0], [1], [0, 0, 1, 1], [], []>, precision = #tpu.contract_precision<fp32>} : vector<16x30xf32>, vector<30x16xf32>, vector<16x16xf32> -> vector<16x16xf32>
    %12 = arith.addf %6, %11 : vector<16x16xf32>
    %c0_14 = arith.constant 0 : index
    %c2 = arith.constant 2 : index
    %c0_15 = arith.constant 0 : index
    %13 = vector.load %arg1[%c0_14, %c2, %c0_15] : memref<1x30x30xf32, #tpu.memory_space<vmem>>, vector<1x16x30xf32>
    %14 = vector.shape_cast %13 : vector<1x16x30xf32> to vector<16x30xf32>
    %c0_16 = arith.constant 0 : index
    %c2_17 = arith.constant 2 : index
    %c0_18 = arith.constant 0 : index
    %c0_19 = arith.constant 0 : index
    %15 = vector.load %arg2[%c0_16, %c2_17, %c0_18, %c0_19] : memref<1x15x30x16xf32, #tpu.memory_space<vmem>>, vector<1x1x30x16xf32>
    %16 = vector.shape_cast %15 : vector<1x1x30x16xf32> to vector<30x16xf32>
    %cst_20 = arith.constant dense<0.000000e+00> : vector<16x16xf32>
    %17 = tpu.matmul %14, %16, %cst_20 {dimension_numbers = #tpu.dot_dimension_numbers<[1], [0], [0], [1], [0, 0, 1, 1], [], []>, precision = #tpu.contract_precision<fp32>} : vector<16x30xf32>, vector<30x16xf32>, vector<16x16xf32> -> vector<16x16xf32>
    %18 = arith.addf %12, %17 : vector<16x16xf32>
    %c0_21 = arith.constant 0 : index
    %c3 = arith.constant 3 : index
    %c0_22 = arith.constant 0 : index
    %19 = vector.load %arg1[%c0_21, %c3, %c0_22] : memref<1x30x30xf32, #tpu.memory_space<vmem>>, vector<1x16x30xf32>
    %20 = vector.shape_cast %19 : vector<1x16x30xf32> to vector<16x30xf32>
    %c0_23 = arith.constant 0 : index
    %c3_24 = arith.constant 3 : index
    %c0_25 = arith.constant 0 : index
    %c0_26 = arith.constant 0 : index
    %21 = vector.load %arg2[%c0_23, %c3_24, %c0_25, %c0_26] : memref<1x15x30x16xf32, #tpu.memory_space<vmem>>, vector<1x1x30x16xf32>
    %22 = vector.shape_cast %21 : vector<1x1x30x16xf32> to vector<30x16xf32>
    %cst_27 = arith.constant dense<0.000000e+00> : vector<16x16xf32>
    %23 = tpu.matmul %20, %22, %cst_27 {dimension_numbers = #tpu.dot_dimension_numbers<[1], [0], [0], [1], [0, 0, 1, 1], [], []>, precision = #tpu.contract_precision<fp32>} : vector<16x30xf32>, vector<30x16xf32>, vector<16x16xf32> -> vector<16x16xf32>
    %24 = arith.addf %18, %23 : vector<16x16xf32>
    %c0_28 = arith.constant 0 : index
    %c4 = arith.constant 4 : index
    %c0_29 = arith.constant 0 : index
    %25 = vector.load %arg1[%c0_28, %c4, %c0_29] : memref<1x30x30xf32, #tpu.memory_space<vmem>>, vector<1x16x30xf32>
    %26 = vector.shape_cast %25 : vector<1x16x30xf32> to vector<16x30xf32>
    %c0_30 = arith.constant 0 : index
    %c4_31 = arith.constant 4 : index
    %c0_32 = arith.constant 0 : index
    %c0_33 = arith.constant 0 : index
    %27 = vector.load %arg2[%c0_30, %c4_31, %c0_32, %c0_33] : memref<1x15x30x16xf32, #tpu.memory_space<vmem>>, vector<1x1x30x16xf32>
    %28 = vector.shape_cast %27 : vector<1x1x30x16xf32> to vector<30x16xf32>
    %cst_34 = arith.constant dense<0.000000e+00> : vector<16x16xf32>
    %29 = tpu.matmul %26, %28, %cst_34 {dimension_numbers = #tpu.dot_dimension_numbers<[1], [0], [0], [1], [0, 0, 1, 1], [], []>, precision = #tpu.contract_precision<fp32>} : vector<16x30xf32>, vector<30x16xf32>, vector<16x16xf32> -> vector<16x16xf32>
    %30 = arith.addf %24, %29 : vector<16x16xf32>
    %c0_35 = arith.constant 0 : index
    %c5 = arith.constant 5 : index
    %c0_36 = arith.constant 0 : index
    %31 = vector.load %arg1[%c0_35, %c5, %c0_36] : memref<1x30x30xf32, #tpu.memory_space<vmem>>, vector<1x16x30xf32>
    %32 = vector.shape_cast %31 : vector<1x16x30xf32> to vector<16x30xf32>
    %c0_37 = arith.constant 0 : index
    %c5_38 = arith.constant 5 : index
    %c0_39 = arith.constant 0 : index
    %c0_40 = arith.constant 0 : index
    %33 = vector.load %arg2[%c0_37, %c5_38, %c0_39, %c0_40] : memref<1x15x30x16xf32, #tpu.memory_space<vmem>>, vector<1x1x30x16xf32>
    %34 = vector.shape_cast %33 : vector<1x1x30x16xf32> to vector<30x16xf32>
    %cst_41 = arith.constant dense<0.000000e+00> : vector<16x16xf32>
    %35 = tpu.matmul %32, %34, %cst_41 {dimension_numbers = #tpu.dot_dimension_numbers<[1], [0], [0], [1], [0, 0, 1, 1], [], []>, precision = #tpu.contract_precision<fp32>} : vector<16x30xf32>, vector<30x16xf32>, vector<16x16xf32> -> vector<16x16xf32>
    %36 = arith.addf %30, %35 : vector<16x16xf32>
    %c0_42 = arith.constant 0 : index
    %c6 = arith.constant 6 : index
    %c0_43 = arith.constant 0 : index
    %37 = vector.load %arg1[%c0_42, %c6, %c0_43] : memref<1x30x30xf32, #tpu.memory_space<vmem>>, vector<1x16x30xf32>
    %38 = vector.shape_cast %37 : vector<1x16x30xf32> to vector<16x30xf32>
    %c0_44 = arith.constant 0 : index
    %c6_45 = arith.constant 6 : index
    %c0_46 = arith.constant 0 : index
    %c0_47 = arith.constant 0 : index
    %39 = vector.load %arg2[%c0_44, %c6_45, %c0_46, %c0_47] : memref<1x15x30x16xf32, #tpu.memory_space<vmem>>, vector<1x1x30x16xf32>
    %40 = vector.shape_cast %39 : vector<1x1x30x16xf32> to vector<30x16xf32>
    %cst_48 = arith.constant dense<0.000000e+00> : vector<16x16xf32>
    %41 = tpu.matmul %38, %40, %cst_48 {dimension_numbers = #tpu.dot_dimension_numbers<[1], [0], [0], [1], [0, 0, 1, 1], [], []>, precision = #tpu.contract_precision<fp32>} : vector<16x30xf32>, vector<30x16xf32>, vector<16x16xf32> -> vector<16x16xf32>
    %42 = arith.addf %36, %41 : vector<16x16xf32>
    %c0_49 = arith.constant 0 : index
    %c7 = arith.constant 7 : index
    %c0_50 = arith.constant 0 : index
    %43 = vector.load %arg1[%c0_49, %c7, %c0_50] : memref<1x30x30xf32, #tpu.memory_space<vmem>>, vector<1x16x30xf32>
    %44 = vector.shape_cast %43 : vector<1x16x30xf32> to vector<16x30xf32>
    %c0_51 = arith.constant 0 : index
    %c7_52 = arith.constant 7 : index
    %c0_53 = arith.constant 0 : index
    %c0_54 = arith.constant 0 : index
    %45 = vector.load %arg2[%c0_51, %c7_52, %c0_53, %c0_54] : memref<1x15x30x16xf32, #tpu.memory_space<vmem>>, vector<1x1x30x16xf32>
    %46 = vector.shape_cast %45 : vector<1x1x30x16xf32> to vector<30x16xf32>
    %cst_55 = arith.constant dense<0.000000e+00> : vector<16x16xf32>
    %47 = tpu.matmul %44, %46, %cst_55 {dimension_numbers = #tpu.dot_dimension_numbers<[1], [0], [0], [1], [0, 0, 1, 1], [], []>, precision = #tpu.contract_precision<fp32>} : vector<16x30xf32>, vector<30x16xf32>, vector<16x16xf32> -> vector<16x16xf32>
    %48 = arith.addf %42, %47 : vector<16x16xf32>
    %c0_56 = arith.constant 0 : index
    %c8 = arith.constant 8 : index
    %c0_57 = arith.constant 0 : index
    %49 = vector.load %arg1[%c0_56, %c8, %c0_57] : memref<1x30x30xf32, #tpu.memory_space<vmem>>, vector<1x16x30xf32>
    %50 = vector.shape_cast %49 : vector<1x16x30xf32> to vector<16x30xf32>
    %c0_58 = arith.constant 0 : index
    %c8_59 = arith.constant 8 : index
    %c0_60 = arith.constant 0 : index
    %c0_61 = arith.constant 0 : index
    %51 = vector.load %arg2[%c0_58, %c8_59, %c0_60, %c0_61] : memref<1x15x30x16xf32, #tpu.memory_space<vmem>>, vector<1x1x30x16xf32>
    %52 = vector.shape_cast %51 : vector<1x1x30x16xf32> to vector<30x16xf32>
    %cst_62 = arith.constant dense<0.000000e+00> : vector<16x16xf32>
    %53 = tpu.matmul %50, %52, %cst_62 {dimension_numbers = #tpu.dot_dimension_numbers<[1], [0], [0], [1], [0, 0, 1, 1], [], []>, precision = #tpu.contract_precision<fp32>} : vector<16x30xf32>, vector<30x16xf32>, vector<16x16xf32> -> vector<16x16xf32>
    %54 = arith.addf %48, %53 : vector<16x16xf32>
    %c0_63 = arith.constant 0 : index
    %c9 = arith.constant 9 : index
    %c0_64 = arith.constant 0 : index
    %55 = vector.load %arg1[%c0_63, %c9, %c0_64] : memref<1x30x30xf32, #tpu.memory_space<vmem>>, vector<1x16x30xf32>
    %56 = vector.shape_cast %55 : vector<1x16x30xf32> to vector<16x30xf32>
    %c0_65 = arith.constant 0 : index
    %c9_66 = arith.constant 9 : index
    %c0_67 = arith.constant 0 : index
    %c0_68 = arith.constant 0 : index
    %57 = vector.load %arg2[%c0_65, %c9_66, %c0_67, %c0_68] : memref<1x15x30x16xf32, #tpu.memory_space<vmem>>, vector<1x1x30x16xf32>
    %58 = vector.shape_cast %57 : vector<1x1x30x16xf32> to vector<30x16xf32>
    %cst_69 = arith.constant dense<0.000000e+00> : vector<16x16xf32>
    %59 = tpu.matmul %56, %58, %cst_69 {dimension_numbers = #tpu.dot_dimension_numbers<[1], [0], [0], [1], [0, 0, 1, 1], [], []>, precision = #tpu.contract_precision<fp32>} : vector<16x30xf32>, vector<30x16xf32>, vector<16x16xf32> -> vector<16x16xf32>
    %60 = arith.addf %54, %59 : vector<16x16xf32>
    %c0_70 = arith.constant 0 : index
    %c10 = arith.constant 10 : index
    %c0_71 = arith.constant 0 : index
    %61 = vector.load %arg1[%c0_70, %c10, %c0_71] : memref<1x30x30xf32, #tpu.memory_space<vmem>>, vector<1x16x30xf32>
    %62 = vector.shape_cast %61 : vector<1x16x30xf32> to vector<16x30xf32>
    %c0_72 = arith.constant 0 : index
    %c10_73 = arith.constant 10 : index
    %c0_74 = arith.constant 0 : index
    %c0_75 = arith.constant 0 : index
    %63 = vector.load %arg2[%c0_72, %c10_73, %c0_74, %c0_75] : memref<1x15x30x16xf32, #tpu.memory_space<vmem>>, vector<1x1x30x16xf32>
    %64 = vector.shape_cast %63 : vector<1x1x30x16xf32> to vector<30x16xf32>
    %cst_76 = arith.constant dense<0.000000e+00> : vector<16x16xf32>
    %65 = tpu.matmul %62, %64, %cst_76 {dimension_numbers = #tpu.dot_dimension_numbers<[1], [0], [0], [1], [0, 0, 1, 1], [], []>, precision = #tpu.contract_precision<fp32>} : vector<16x30xf32>, vector<30x16xf32>, vector<16x16xf32> -> vector<16x16xf32>
    %66 = arith.addf %60, %65 : vector<16x16xf32>
    %c0_77 = arith.constant 0 : index
    %c11 = arith.constant 11 : index
    %c0_78 = arith.constant 0 : index
    %67 = vector.load %arg1[%c0_77, %c11, %c0_78] : memref<1x30x30xf32, #tpu.memory_space<vmem>>, vector<1x16x30xf32>
    %68 = vector.shape_cast %67 : vector<1x16x30xf32> to vector<16x30xf32>
    %c0_79 = arith.constant 0 : index
    %c11_80 = arith.constant 11 : index
    %c0_81 = arith.constant 0 : index
    %c0_82 = arith.constant 0 : index
    %69 = vector.load %arg2[%c0_79, %c11_80, %c0_81, %c0_82] : memref<1x15x30x16xf32, #tpu.memory_space<vmem>>, vector<1x1x30x16xf32>
    %70 = vector.shape_cast %69 : vector<1x1x30x16xf32> to vector<30x16xf32>
    %cst_83 = arith.constant dense<0.000000e+00> : vector<16x16xf32>
    %71 = tpu.matmul %68, %70, %cst_83 {dimension_numbers = #tpu.dot_dimension_numbers<[1], [0], [0], [1], [0, 0, 1, 1], [], []>, precision = #tpu.contract_precision<fp32>} : vector<16x30xf32>, vector<30x16xf32>, vector<16x16xf32> -> vector<16x16xf32>
    %72 = arith.addf %66, %71 : vector<16x16xf32>
    %c0_84 = arith.constant 0 : index
    %c12 = arith.constant 12 : index
    %c0_85 = arith.constant 0 : index
    %73 = vector.load %arg1[%c0_84, %c12, %c0_85] : memref<1x30x30xf32, #tpu.memory_space<vmem>>, vector<1x16x30xf32>
    %74 = vector.shape_cast %73 : vector<1x16x30xf32> to vector<16x30xf32>
    %c0_86 = arith.constant 0 : index
    %c12_87 = arith.constant 12 : index
    %c0_88 = arith.constant 0 : index
    %c0_89 = arith.constant 0 : index
    %75 = vector.load %arg2[%c0_86, %c12_87, %c0_88, %c0_89] : memref<1x15x30x16xf32, #tpu.memory_space<vmem>>, vector<1x1x30x16xf32>
    %76 = vector.shape_cast %75 : vector<1x1x30x16xf32> to vector<30x16xf32>
    %cst_90 = arith.constant dense<0.000000e+00> : vector<16x16xf32>
    %77 = tpu.matmul %74, %76, %cst_90 {dimension_numbers = #tpu.dot_dimension_numbers<[1], [0], [0], [1], [0, 0, 1, 1], [], []>, precision = #tpu.contract_precision<fp32>} : vector<16x30xf32>, vector<30x16xf32>, vector<16x16xf32> -> vector<16x16xf32>
    %78 = arith.addf %72, %77 : vector<16x16xf32>
    %c0_91 = arith.constant 0 : index
    %c13 = arith.constant 13 : index
    %c0_92 = arith.constant 0 : index
    %79 = vector.load %arg1[%c0_91, %c13, %c0_92] : memref<1x30x30xf32, #tpu.memory_space<vmem>>, vector<1x16x30xf32>
    %80 = vector.shape_cast %79 : vector<1x16x30xf32> to vector<16x30xf32>
    %c0_93 = arith.constant 0 : index
    %c13_94 = arith.constant 13 : index
    %c0_95 = arith.constant 0 : index
    %c0_96 = arith.constant 0 : index
    %81 = vector.load %arg2[%c0_93, %c13_94, %c0_95, %c0_96] : memref<1x15x30x16xf32, #tpu.memory_space<vmem>>, vector<1x1x30x16xf32>
    %82 = vector.shape_cast %81 : vector<1x1x30x16xf32> to vector<30x16xf32>
    %cst_97 = arith.constant dense<0.000000e+00> : vector<16x16xf32>
    %83 = tpu.matmul %80, %82, %cst_97 {dimension_numbers = #tpu.dot_dimension_numbers<[1], [0], [0], [1], [0, 0, 1, 1], [], []>, precision = #tpu.contract_precision<fp32>} : vector<16x30xf32>, vector<30x16xf32>, vector<16x16xf32> -> vector<16x16xf32>
    %84 = arith.addf %78, %83 : vector<16x16xf32>
    %c0_98 = arith.constant 0 : index
    %c14 = arith.constant 14 : index
    %c0_99 = arith.constant 0 : index
    %85 = vector.load %arg1[%c0_98, %c14, %c0_99] : memref<1x30x30xf32, #tpu.memory_space<vmem>>, vector<1x16x30xf32>
    %86 = vector.shape_cast %85 : vector<1x16x30xf32> to vector<16x30xf32>
    %c0_100 = arith.constant 0 : index
    %c14_101 = arith.constant 14 : index
    %c0_102 = arith.constant 0 : index
    %c0_103 = arith.constant 0 : index
    %87 = vector.load %arg2[%c0_100, %c14_101, %c0_102, %c0_103] : memref<1x15x30x16xf32, #tpu.memory_space<vmem>>, vector<1x1x30x16xf32>
    %88 = vector.shape_cast %87 : vector<1x1x30x16xf32> to vector<30x16xf32>
    %cst_104 = arith.constant dense<0.000000e+00> : vector<16x16xf32>
    %89 = tpu.matmul %86, %88, %cst_104 {dimension_numbers = #tpu.dot_dimension_numbers<[1], [0], [0], [1], [0, 0, 1, 1], [], []>, precision = #tpu.contract_precision<fp32>} : vector<16x30xf32>, vector<30x16xf32>, vector<16x16xf32> -> vector<16x16xf32>
    %90 = arith.addf %84, %89 : vector<16x16xf32>
    %c0_105 = arith.constant 0 : index
    %c0_106 = arith.constant 0 : index
    %c0_107 = arith.constant 0 : index
    %91 = vector.load %arg3[%c0_105, %c0_106, %c0_107] : memref<1x16x16xf32, #tpu.memory_space<vmem>>, vector<1x16x16xf32>
    %92 = vector.shape_cast %91 : vector<1x16x16xf32> to vector<16x16xf32>
    %93 = vector.shape_cast %90 : vector<16x16xf32> to vector<1x16x16xf32>
    tpu.vector_store %arg3[%c0_105, %c0_106, %c0_107], %93 {strides = array<i32>} : memref<1x16x16xf32, #tpu.memory_space<vmem>>, vector<1x16x16xf32>,
    return
  }
  func.func @transform_0(%arg0: i32) -> (i32, i32, i32) {
    %c0_i32 = arith.constant 0 : i32
    %c0_i32_0 = arith.constant 0 : i32
    %c0_i32_1 = arith.constant 0 : i32
    return %arg0, %c0_i32, %c0_i32_0 : i32, i32, i32
  }
  func.func @transform_1(%arg0: i32) -> (i32, i32, i32, i32) {
    %c0_i32 = arith.constant 0 : i32
    %c0_i32_0 = arith.constant 0 : i32
    %c0_i32_1 = arith.constant 0 : i32
    %c0_i32_2 = arith.constant 0 : i32
    %c0_i32_3 = arith.constant 0 : i32
    return %c0_i32, %c0_i32_0, %c0_i32_1, %c0_i32_2 : i32, i32, i32, i32
  }
  func.func @transform_2(%arg0: i32) -> (i32, i32, i32) {
    %c0_i32 = arith.constant 0 : i32
    %c0_i32_0 = arith.constant 0 : i32
    %c0_i32_1 = arith.constant 0 : i32
    return %arg0, %c0_i32, %c0_i32_0 : i32, i32, i32
  }
}

</mosaic_0001>

<bundles_post_ra>
// kernel: tpu_custom_call.1
= control target key start
LH: loop header
LB: loop body
LE: loop exit
PB: predicated region body
PF: predicated region fallthrough
CT: control target
= control target key end

     0   :  { %7 = vsyncpa [#allocation3], 0  ;;  %s12277_s0 = inlined_call_operand.vmem [shape: f32[8,30,30], index: 0, kind: input, shape index: {}]   ;;  %s12278_s1 = inlined_call_operand.vmem [shape: f32[1,15,30,16], index: 1, kind: input, shape index: {}]   ;;  %s12279_s2 = inlined_call_operand.hbm [shape: f32[8,16,16], index: 2, kind: output, shape index: {}]  }
   0x1   :  { %9 = vsyncpa [#allocation3 + $0x1], 0  ;;  %s10129_s9 = smov 0   ;;  %s10131_s10 = smov 0  }
   0x2   :  { %s10133_s11 = smov 0   ;;  %s10135_s12 = smov 0  }
   0x3 LB: > { %s10150_s13 = sadd.s32 4294967295, %s10109_s12   ;;  %s8408_s14 = sadd.s32 4294967294, %s10109_s12   ;;  %s10109_s12 = sphi %s10135_s12, %s12317_s12   ;;  %s10105_s11 = sphi %s10133_s11, %s12316_s11   ;;  %s10101_s10 = sphi %s10131_s10, %s12315_s10   ;;  %s10097_s9 = sphi %s10129_s9, %s12314_s9  }
   0x4   : > { %s10154_s15 = sadd.s32 1, %s10109_s12   ;;  %s69_s16 = sadd.s32 1, %s10105_s11 }
   0x5   : > { %s66_s17 = ssub.s32 %s10109_s12, %s10154_s15  ;;  %p79_p0 = scmp.ne.s32.totalorder %s10105_s11, %s10101_s10 }
   0x6   : > { %p67_p1 = scmp.eq.s32.totalorder %s66_s17, 0  ;;  %p80_p2 = scmp.eq.s32.totalorder %s10150_s13, 7 }
   0x7   : > { %p85_p3 = scmp.ne.s32.totalorder %s10101_s10, %s10097_s9  ;;  %p86_p4 = scmp.eq.s32.totalorder %s8408_s14, 7 }
   0x8   : > { %s10165_s18 = scalar_select %p67_p1, %s10105_s11, %s69_s16  }
   0x9   : > { %p10167_p5 = por %p80_p2, %p79_p0  ;;  %p10171_p6 = por %p86_p4, %p85_p3 }
   0xa   : > { %p8411_p7 = scmp.ge.s32.totalorder %s10109_s12, 1  ;;  %p115_p8 = scmp.lt.s32.totalorder %s10109_s12, 9 }
   0xc   : > { %p116_p9 = pnand %p8411_p7, %p115_p8 }
   0xe   : > { %119 = sbr.rel (%p116_p9) target bundleno = 692 (0x2b4), region = 28 }
  0x13   : > { %v8418_v0 = vld [vmem:[%s12278_s1 + $0x38] sm:$0x3f]  ;;  %vm162_vm0 = vcmask 1045504   ;;  %v8417_v1 = vld [vmem:[%s12278_s1 + $0x30] sm:$0xff]  ;;  %v8416_v2 = vld [vmem:[%s12278_s1 + $0x28] sm:$0xff]  ;;  %p137_p10 = scmp.lt.s32.totalorder %s10150_s13, 7 }
  0x14   : > { %v164_v3 = vsel %vm162_vm0, %v8418_v0, 0  ;;  %v10188_v4 = vand.u32 4294901760, %v8417_v1  ;;  %v10190_v5 = vand.u32 4294901760, %v8416_v2  ;;  %v8415_v6 = vld [vmem:[%s12278_s1 + $0x20] sm:$0xff]  ;;  %vm155_vm1 = vcmask 244736   ;;  %v146_v41 = vld [vmem:[%s12278_s1 + $0x10] sm:$0xff] }
  0x15   : > { %v10195_v7 = vand.u32 4294901760, %v164_v3  ;;  %v10197_v8 = vand.u32 4294901760, %v8415_v6  ;;  %s138_s29 = scalar_select %p137_p10, %s10150_s13, 7  ;;  %v147_v37 = vld [vmem:[%s12278_s1 + $0x18] sm:$0x3f]  ;;  %v145_v45 = vld [vmem:[%s12278_s1 + $0x8] sm:$0xff] }
  0x16   : > { %v288_v9 = vsub.f32 %v8417_v1, %v10188_v4  ;;  %v10202_v10 = vsub.f32 %v8416_v2, %v10190_v5  ;;  %v701_v40 = vsel %vm162_vm0, %v147_v37, 0  ;;  %v10267_v46 = vand.u32 4294901760, %v146_v41  ;;  %v144_v51 = vld [vmem:[%s12278_s1] sm:$0xff]  ;;  %s134_s14 = sand.u32 1, %s10101_s10   ;;  %s8477_s22 = sshll.u32 %s10150_s13, 8 }
  0x17   : > { %9018 = vmatprep.subr.mxu0 %v10195_v7  ;;  %v281_v11 = vsub.f32 %v164_v3, %v10195_v7  ;;  %s8476_s30 = sshll.u32 %s138_s29, 5  ;;  %v10207_v12 = vsub.f32 %v8415_v6, %v10197_v8  ;;  %v10258_v43 = vand.u32 4294901760, %v701_v40  ;;  %v10278_v50 = vand.u32 4294901760, %v145_v45  ;;  %s8412_s16 = sshll.u32 %s134_s14, 4 }
  0x18   : > { %9019 = vmatpush3.msra.mxu0 %v10195_v7  ;;  %v10210_v13 = vand.u32 4294901760, %v288_v9  ;;  %v10213_v14 = vand.u32 4294901760, %v10202_v10  ;;  %s10218_s5 = scalar_lea.vmem %s12277_s0, %s8476_s30  ;;  %v10288_v53 = vsub.f32 %v146_v41, %v10267_v46  ;;  %v10294_v55 = vand.u32 4294901760, %v144_v51  ;;  %s136_s17 = scalar_lea.vmem [#allocation2], %s8412_s16 }
  0x19   : > { %9020 = vmatprep.subr.mxu0 %v10188_v4  ;;  %v10221_v15 = vand.u32 4294901760, %v281_v11  ;;  %v148_v16 = vld [vmem:[%s10218_s5 + $0x1] sm:$0xff]  ;;  %v10225_v17 = vand.u32 4294901760, %v10207_v12  ;;  %v149_v18 = vld [vmem:[%s10218_s5 + $0x9] sm:$0xff]  ;;  %v10276_v49 = vsub.f32 %v701_v40, %v10258_v43  ;;  %v10301_v57 = vsub.f32 %v145_v45, %v10278_v50  ;;  %s8346_s21 = sshll.u32 %s136_s17, 4  ;;  %s12231_s25 = scalar_lea.hbm %s12279_s2, %s8477_s22  ;;  %s12233_s21 = int_to_ptr.vmem [resolvable:$true] %s8346_s21 }
  0x1a   : > { %9021 = vmatpush3.msra.mxu0 %v10188_v4  ;;  %v290_v19 = vsub.f32 %v288_v9, %v10210_v13  ;;  %v157_v20 = vsel %vm155_vm1, %v148_v16, 0  ;;  %v160_v21 = vsel %vm155_vm1, %v149_v18, 0  ;;  %v297_v23 = vsub.f32 %v10202_v10, %v10213_v14  ;;  %v142_v42 = vld [vmem:[%s10218_s5] sm:$0xff]  ;;  %v143_v44 = vld [vmem:[%s10218_s5 + $0x8] sm:$0xff]  ;;  %v8421_v16 = vld [vmem:[%s12278_s1 + $0x50] sm:$0xff]  ;;  %s12237_s13 = scalar_lea.sflag [#allocation3], %s134_s14 }
  0x1b   : > { %v283_v22 = vsub.f32 %v281_v11, %v10221_v15  ;;  %9022 = vmatprep.subr.mxu0 %v10190_v5  ;;  %v10236_v24 = vand.u32 4294901760, %v157_v20  ;;  %v10238_v25 = vand.u32 4294901760, %v160_v21  ;;  %v304_v26 = vsub.f32 %v10207_v12, %v10225_v17  ;;  %s10049_s26 = scalar_lea.vmem %s12233_s21, 256  ;;  %s10111_s27 = smov [#allocation2]  }
  0x1c   : > { %9023 = vmatpush3.msra.mxu0 %v10190_v5  ;;  %v291_v28 = vand.u32 4294901760, %v290_v19  ;;  %v298_v31 = vand.u32 4294901760, %v297_v23  ;;  %v695_v47 = vsel %vm155_vm1, %v142_v42, 0  ;;  %v698_v48 = vsel %vm155_vm1, %v143_v44, 0  ;;  %v1232_v19 = vld [vmem:[%s10218_s5 + $0xa] sm:$0xff]  ;;  %p10050_p11 = scmp.ne.s32.totalorder %s12233_s21, %s10049_s26  ;;  %s10053_s28 = sshll.u32 %s10111_s27, 4  ;;  %s10054_s28 = int_to_ptr.vmem [resolvable:$false] %s10053_s28 }
  0x1d   : > { %v284_v27 = vand.u32 4294901760, %v283_v22  ;;  %9024 = vmatprep.subr.mxu0 %v10197_v8  ;;  %v236_v29 = vsub.f32 %v157_v20, %v10236_v24  ;;  %v246_v30 = vsub.f32 %v160_v21, %v10238_v25  ;;  %9037 = vmatprep.mubr.f32.mxu1 %v10236_v24  ;;  %v305_v35 = vand.u32 4294901760, %v304_v26  ;;  %v8420_v20 = vld [vmem:[%s12278_s1 + $0x48] sm:$0xff]  ;;  %v8419_v26 = vld [vmem:[%s12278_s1 + $0x40] sm:$0xff]  ;;  %s10055_s29 = scalar_lea.vmem %s10054_s28, 512  ;;  %p10056_p0 = scmp.lt.s32.totalorder %s12233_s21, %s10054_s28 }
  0x1e   : > { %9025 = vmatpush3.msra.mxu0 %v10197_v8  ;;  %v10284_v52 = vand.u32 4294901760, %v695_v47  ;;  %v10290_v54 = vand.u32 4294901760, %v698_v48  ;;  %v10298_v56 = vand.u32 4294901760, %v10276_v49  ;;  %v10310_v59 = vand.u32 4294901760, %v10288_v53  ;;  %p10051_p12 = pnand %p10050_p11, %p10167_p5  ;;  %p10057_p1 = scmp.lt.s32.totalorder %s10055_s29, %s10049_s26 }
  0x1f   : > { %9029 = vmatprep.subr.mxu1 %v284_v27  ;;  %v237_v32 = vand.u32 4294901760, %v236_v29  ;;  %9040 = vmatprep.subr.mxu0 %v281_v11  ;;  %v247_v33 = vand.u32 4294901760, %v246_v30  ;;  %v10318_v61 = vsub.f32 %v144_v51, %v10294_v55  ;;  %v10325_v63 = vand.u32 4294901760, %v10301_v57 }
  0x20   : > { %9030 = vmatpush3.msra.mxu1 %v284_v27  ;;  %v10305_v58 = vsub.f32 %v695_v47, %v10284_v52  ;;  %v10313_v60 = vsub.f32 %v698_v48, %v10290_v54  ;;  %v820_v62 = vsub.f32 %v10276_v49, %v10298_v56  ;;  %v827_v1 = vsub.f32 %v10288_v53, %v10310_v59  ;;  %p10052_p13 = pneg %p10051_p12  ;;  %p10058_p2 = por %p10057_p1, %p10056_p0 }
  0x21   : > { %9031 = vmatprep.subr.mxu1 %v291_v28  ;;  %v238_v34 = vsub.f32 %v236_v29, %v237_v32  ;;  %v248_v36 = vsub.f32 %v246_v30, %v247_v33  ;;  %v10338_v3 = vand.u32 4294901760, %v10318_v61  ;;  %v834_v6 = vsub.f32 %v10301_v57, %v10325_v63 }
  0x22   : > { %9032 = vmatpush3.msra.mxu1 %v291_v28  ;;  %v774_v0 = vand.u32 4294901760, %v10305_v58  ;;  %v784_v2 = vand.u32 4294901760, %v10313_v60  ;;  %v10388_v21 = vand.u32 4294901760, %v8421_v16  ;;  %v1242_v23 = vsel %vm155_vm1, %v1232_v19, 0  ;;  %p10059_p3 = pnand %p10058_p2, %p10052_p13 }
  0x23   : > { %9033 = vmatprep.subr.mxu1 %v298_v31  ;;  %v239_v38 = vand.u32 4294901760, %v238_v34  ;;  %v249_v39 = vand.u32 4294901760, %v248_v36  ;;  %vm8329_vm2 = vcmask 130048  }
  0x24   : > { %9034 = vmatpush3.msra.mxu1 %v298_v31  ;;  %v10411_v28 = vsub.f32 %v8421_v16, %v10388_v21 }
  0x25   : > { %9026 = vmatprep.mubr.f32.mxu0 %v239_v38  ;;  %9035 = vmatprep.subr.mxu1 %v305_v35 }
  0x26   : > { %9027 = vmatmul.mubr.f32.vlgmr.msra.gmra.mxu0 %v249_v39  ;;  %9036 = vmatpush3.msra.mxu1 %v305_v35  ;;  %v10437_v34 = vand.u32 4294901760, %v10411_v28 }
  0x27   : > { %9041 = vmatpush3.msra.mxu0 %v281_v11  ;;  %9038 = vmatmul.mubr.f32.vlgmr.msra.gmra.mxu1 %v10238_v25  ;;  %v835_v11 = vand.u32 4294901760, %v834_v6 }
  0x28   : > { %9042 = vmatprep.subr.mxu0 %v288_v9  ;;  %9051 = vmatprep.subr.mxu1 %v10195_v7  ;;  %v1371_v40 = vsub.f32 %v10411_v28, %v10437_v34 }
  0x29   : > { %9043 = vmatpush3.msra.mxu0 %v288_v9  ;;  %9052 = vmatpush3.msra.mxu1 %v10195_v7  ;;  %v828_v9 = vand.u32 4294901760, %v827_v1  ;;  %v8423_v1 = vld [vmem:[%s12278_s1 + $0x60] sm:$0xff] }
  0x2a   : > { %9044 = vmatprep.subr.mxu0 %v10202_v10  ;;  %9053 = vmatprep.subr.mxu1 %v10188_v4  ;;  %v10544_v6 = vand.u32 4294901760, %v8423_v1 }
  0x2b   : > { %9045 = vmatpush3.msra.mxu0 %v10202_v10  ;;  %9054 = vmatpush3.msra.mxu1 %v10188_v4  ;;  %v841_v10 = vsub.f32 %v10318_v61, %v10338_v3 }
  0x2c   : > { %9046 = vmatprep.subr.mxu0 %v10207_v12  ;;  %9055 = vmatprep.subr.mxu1 %v10190_v5 }
  0x2d   : > { %9047 = vmatpush3.msra.mxu0 %v10207_v12  ;;  %9048 = vmatprep.mubr.f32.mxu0 %v236_v29  ;;  %v10413_v29 = vand.u32 4294901760, %v1242_v23 }
  0x2e   : > { %9056 = vmatpush3.msra.mxu1 %v10190_v5  ;;  %9049 = vmatmul.mubr.f32.vlgmr.msra.gmra.mxu0 %v246_v30  ;;  %v10417_v30 = vand.u32 4294901760, %v8419_v26 }
  0x2f   : > { %9057 = vmatprep.subr.mxu1 %v10197_v8  ;;  %9062 = vmatprep.subr.mxu0 %v10221_v15  ;;  %v10440_v35 = vsub.f32 %v1242_v23, %v10413_v29 }
  0x30   : > { %9058 = vmatpush3.msra.mxu1 %v10197_v8  ;;  %9059 = vmatprep.mubr.f32.mxu1 %v237_v32  ;;  %v10445_v36 = vsub.f32 %v8419_v26, %v10417_v30 }
  0x31   : > { %9063 = vmatpush3.msra.mxu0 %v10221_v15  ;;  %9060 = vmatmul.mubr.f32.vlgmr.msra.gmra.mxu1 %v247_v33  ;;  %v1328_v41 = vand.u32 4294901760, %v10440_v35 }
  0x32   : > { %9064 = vmatprep.subr.mxu0 %v10210_v13  ;;  %9073 = vmatprep.subr.mxu1 %v10195_v7  ;;  %v10465_v42 = vand.u32 4294901760, %v10445_v36 }
  0x33   : > { %9065 = vmatpush3.msra.mxu0 %v10210_v13  ;;  %9074 = vmatpush3.msra.mxu1 %v10195_v7  ;;  %v775_v7 = vsub.f32 %v10305_v58, %v774_v0  ;;  %v842_v13 = vand.u32 4294901760, %v841_v10  ;;  %v1329_v47 = vsub.f32 %v10440_v35, %v1328_v41 }
  0x34   : > { %9066 = vmatprep.subr.mxu0 %v10213_v14  ;;  %9075 = vmatprep.subr.mxu1 %v10188_v4  ;;  %v1385_v48 = vsub.f32 %v10445_v36, %v10465_v42 }
  0x35   : > { %9067 = vmatpush3.msra.mxu0 %v10213_v14  ;;  %9076 = vmatpush3.msra.mxu1 %v10188_v4  ;;  %v821_v4 = vand.u32 4294901760, %v820_v62  ;;  %v8422_v14 = vld [vmem:[%s12278_s1 + $0x58] sm:$0x3f]  ;;  %v1330_v51 = vand.u32 4294901760, %v1329_v47 }
  0x36   : > { %9068 = vmatprep.subr.mxu0 %v10225_v17  ;;  %9077 = vmatprep.subr.mxu1 %v10190_v5  ;;  %v1245_v15 = vsel %vm162_vm0, %v8422_v14, 0 }
  0x37   : > { %9069 = vmatpush3.msra.mxu0 %v10225_v17  ;;  %9070 = vmatprep.mubr.f32.mxu0 %v10236_v24  ;;  %v1231_v17 = vld [vmem:[%s10218_s5 + $0x2] sm:$0xff]  ;;  %v10378_v18 = vand.u32 4294901760, %v1245_v15 }
  0x38   : > { %9078 = vmatpush3.msra.mxu1 %v10190_v5  ;;  %9071 = vmatmul.mubr.f32.vlgmr.msra.gmra.mxu0 %v10238_v25  ;;  %v785_v5 = vsub.f32 %v10313_v60, %v784_v2  ;;  %v1239_v22 = vsel %vm155_vm1, %v1231_v17, 0 }
  0x39   : > { %9079 = vmatprep.subr.mxu1 %v10197_v8  ;;  %9084 = vmatprep.subr.mxu0 %v10258_v43  ;;  %v10406_v27 = vand.u32 4294901760, %v1239_v22 }
  0x3a   : > { %9080 = vmatpush3.msra.mxu1 %v10197_v8  ;;  %9081 = vmatprep.mubr.f32.mxu1 %v10236_v24  ;;  %v776_v8 = vand.u32 4294901760, %v775_v7  ;;  %v786_v12 = vand.u32 4294901760, %v785_v5  ;;  %v10397_v24 = vsub.f32 %v1245_v15, %v10378_v18 }
  0x3b   : > { %9085 = vmatpush3.msra.mxu0 %v10258_v43  ;;  %9082 = vmatmul.mubr.f32.vlgmr.msra.gmra.mxu1 %v10238_v25  ;;  %v10399_v25 = vand.u32 4294901760, %v8420_v20  ;;  %v10432_v33 = vsub.f32 %v1239_v22, %v10406_v27 }
  0x3c   : > { %9086 = vmatprep.subr.mxu0 %v10267_v46  ;;  %9095 = vmatprep.subr.mxu1 %v821_v4  ;;  %v10423_v31 = vand.u32 4294901760, %v10397_v24 }
  0x3d   : > { %9087 = vmatpush3.msra.mxu0 %v10267_v46  ;;  %9096 = vmatpush3.msra.mxu1 %v821_v4  ;;  %v10426_v32 = vsub.f32 %v8420_v20, %v10399_v25  ;;  %v1318_v39 = vand.u32 4294901760, %v10432_v33 }
  0x3e   : > { %9088 = vmatprep.subr.mxu0 %v10278_v50  ;;  %9097 = vmatprep.subr.mxu1 %v828_v9  ;;  %v1364_v37 = vsub.f32 %v10397_v24, %v10423_v31 }
  0x3f   : > { %9089 = vmatpush3.msra.mxu0 %v10278_v50  ;;  %9098 = vmatpush3.msra.mxu1 %v828_v9  ;;  %v10452_v38 = vand.u32 4294901760, %v10426_v32  ;;  %v1319_v45 = vsub.f32 %v10432_v33, %v1318_v39 }
  0x40   : > { %9090 = vmatprep.subr.mxu0 %v10294_v55  ;;  %9099 = vmatprep.subr.mxu1 %v835_v11 }
  0x41   : > { %9091 = vmatpush3.msra.mxu0 %v10294_v55  ;;  %9092 = vmatprep.mubr.f32.mxu0 %v776_v8  ;;  %v1378_v44 = vsub.f32 %v10426_v32, %v10452_v38  ;;  %v10572_v8 = vsub.f32 %v8423_v1, %v10544_v6 }
  0x42   : > { %9100 = vmatpush3.msra.mxu1 %v835_v11  ;;  %9093 = vmatmul.mubr.f32.vlgmr.msra.gmra.mxu0 %v786_v12 }
  0x43   : > { %9101 = vmatprep.subr.mxu1 %v842_v13  ;;  %9106 = vmatprep.subr.mxu0 %v10276_v49  ;;  %v10592_v17 = vand.u32 4294901760, %v10572_v8 }
  0x44   : > { %9102 = vmatpush3.msra.mxu1 %v842_v13  ;;  %9103 = vmatprep.mubr.f32.mxu1 %v10284_v52 }
  0x45   : > { %9107 = vmatpush3.msra.mxu0 %v10276_v49  ;;  %9104 = vmatmul.mubr.f32.vlgmr.msra.gmra.mxu1 %v10290_v54  ;;  %v1379_v49 = vand.u32 4294901760, %v1378_v44  ;;  %v1931_v23 = vsub.f32 %v10572_v8, %v10592_v17 }
  0x46   : > { %9108 = vmatprep.subr.mxu0 %v10288_v53  ;;  %9117 = vmatprep.subr.mxu1 %v10258_v43 }
  0x47   : > { %9109 = vmatpush3.msra.mxu0 %v10288_v53  ;;  %9118 = vmatpush3.msra.mxu1 %v10258_v43  ;;  %v8426_v53 = vld [vmem:[%s12278_s1 + $0x78] sm:$0x3f] }
  0x48   : > { %9110 = vmatprep.subr.mxu0 %v10301_v57  ;;  %9119 = vmatprep.subr.mxu1 %v10267_v46 }
  0x49   : > { %9111 = vmatpush3.msra.mxu0 %v10301_v57  ;;  %9120 = vmatpush3.msra.mxu1 %v10267_v46 }
  0x4a   : > { %9112 = vmatprep.subr.mxu0 %v10318_v61  ;;  %9121 = vmatprep.subr.mxu1 %v10278_v50 }
  0x4b   : > { %9113 = vmatpush3.msra.mxu0 %v10318_v61  ;;  %9114 = vmatprep.mubr.f32.mxu0 %v10305_v58  ;;  %v1778_v58 = vld [vmem:[%s10218_s5 + $0xb] sm:$0xff] }
  0x4c   : > { %9122 = vmatpush3.msra.mxu1 %v10278_v50  ;;  %9115 = vmatmul.mubr.f32.vlgmr.msra.gmra.mxu0 %v10313_v60  ;;  %v1788_v62 = vsel %vm155_vm1, %v1778_v58, 0 }
  0x4d   : > { %9123 = vmatprep.subr.mxu1 %v10294_v55  ;;  %9128 = vmatprep.subr.mxu0 %v10298_v56  ;;  %v10540_v4 = vand.u32 4294901760, %v1788_v62 }
  0x4e   : > { %9124 = vmatpush3.msra.mxu1 %v10294_v55  ;;  %9125 = vmatprep.mubr.f32.mxu1 %v774_v0 }
  0x4f   : > { %9129 = vmatpush3.msra.mxu0 %v10298_v56  ;;  %9126 = vmatmul.mubr.f32.vlgmr.msra.gmra.mxu1 %v784_v2  ;;  %v1777_v56 = vld [vmem:[%s10218_s5 + $0x3] sm:$0xff]  ;;  %v10567_v11 = vsub.f32 %v1788_v62, %v10540_v4 }
  0x50   : > { %9130 = vmatprep.subr.mxu0 %v10310_v59  ;;  %9139 = vmatprep.subr.mxu1 %v10258_v43  ;;  %v1785_v61 = vsel %vm155_vm1, %v1777_v56, 0 }
  0x51   : > { %9131 = vmatpush3.msra.mxu0 %v10310_v59  ;;  %9140 = vmatpush3.msra.mxu1 %v10258_v43  ;;  %v1365_v43 = vand.u32 4294901760, %v1364_v37  ;;  %v8424_v59 = vld [vmem:[%s12278_s1 + $0x68] sm:$0xff]  ;;  %v10533_v2 = vand.u32 4294901760, %v1785_v61  ;;  %v1874_v16 = vand.u32 4294901760, %v10567_v11 }
  0x52   : > { %9132 = vmatprep.subr.mxu0 %v10325_v63  ;;  %9141 = vmatprep.subr.mxu1 %v10267_v46  ;;  %v10526_v0 = vand.u32 4294901760, %v8424_v59 }
  0x53   : > { %9133 = vmatpush3.msra.mxu0 %v10325_v63  ;;  %9142 = vmatpush3.msra.mxu1 %v10267_v46  ;;  %v1372_v46 = vand.u32 4294901760, %v1371_v40  ;;  %v10559_v5 = vsub.f32 %v1785_v61, %v10533_v2  ;;  %v1875_v22 = vsub.f32 %v10567_v11, %v1874_v16  ;;  %v8427_v40 = vld [vmem:[%s12278_s1 + $0x80] sm:$0xff] }
  0x54   : > { %9134 = vmatprep.subr.mxu0 %v10338_v3  ;;  %9143 = vmatprep.subr.mxu1 %v10278_v50  ;;  %v10553_v9 = vsub.f32 %v8424_v59, %v10526_v0  ;;  %v10671_v44 = vand.u32 4294901760, %v8427_v40 }
  0x55   : > { %9135 = vmatpush3.msra.mxu0 %v10338_v3  ;;  %9136 = vmatprep.mubr.f32.mxu0 %v10284_v52  ;;  %v1864_v14 = vand.u32 4294901760, %v10559_v5  ;;  %v1876_v26 = vand.u32 4294901760, %v1875_v22 }
  0x56   : > { %9144 = vmatpush3.msra.mxu1 %v10278_v50  ;;  %9137 = vmatmul.mubr.f32.vlgmr.msra.gmra.mxu0 %v10290_v54  ;;  %v1320_v50 = vand.u32 4294901760, %v1319_v45  ;;  %v10579_v13 = vand.u32 4294901760, %v10553_v9 }
  0x57   : > { %9145 = vmatprep.subr.mxu1 %v10294_v55  ;;  %9150 = vmatprep.subr.mxu0 %v10378_v18  ;;  %v1865_v20 = vsub.f32 %v10559_v5, %v1864_v14 }
  0x58   : > { %9146 = vmatpush3.msra.mxu1 %v10294_v55  ;;  %9147 = vmatprep.mubr.f32.mxu1 %v10284_v52  ;;  %v1386_v52 = vand.u32 4294901760, %v1385_v48  ;;  %v8425_v55 = vld [vmem:[%s12278_s1 + $0x70] sm:$0xff]  ;;  %v1924_v19 = vsub.f32 %v10553_v9, %v10579_v13 }
  0x59   : > { %9151 = vmatpush3.msra.mxu0 %v10378_v18  ;;  %9148 = vmatmul.mubr.f32.vlgmr.msra.gmra.mxu1 %v10290_v54  ;;  %v1791_v54 = vsel %vm162_vm0, %v8426_v53, 0  ;;  %v10515_v60 = vand.u32 4294901760, %v8425_v55 }
  0x5a   : > { %9152 = vmatprep.subr.mxu0 %v10388_v21  ;;  %9161 = vmatprep.subr.mxu1 %v1365_v43  ;;  %v10505_v57 = vand.u32 4294901760, %v1791_v54 }
  0x5b   : > { %9153 = vmatpush3.msra.mxu0 %v10388_v21  ;;  %9162 = vmatpush3.msra.mxu1 %v1365_v43  ;;  %v10538_v3 = vsub.f32 %v8425_v55, %v10515_v60 }
  0x5c   : > { %9154 = vmatprep.subr.mxu0 %v10399_v25  ;;  %9163 = vmatprep.subr.mxu1 %v1372_v46  ;;  %v10524_v63 = vsub.f32 %v1791_v54, %v10505_v57 }
  0x5d   : > { %9155 = vmatpush3.msra.mxu0 %v10399_v25  ;;  %9164 = vmatpush3.msra.mxu1 %v1372_v46  ;;  %v10564_v10 = vand.u32 4294901760, %v10538_v3 }
  0x5e   : > { %9156 = vmatprep.subr.mxu0 %v10417_v30  ;;  %9165 = vmatprep.subr.mxu1 %v1379_v49  ;;  %v10550_v7 = vand.u32 4294901760, %v10524_v63 }
  0x5f   : > { %9157 = vmatpush3.msra.mxu0 %v10417_v30  ;;  %9158 = vmatprep.mubr.f32.mxu0 %v1320_v50  ;;  %v1917_v15 = vsub.f32 %v10538_v3, %v10564_v10  ;;  %v10699_v50 = vsub.f32 %v8427_v40, %v10671_v44 }
  0x60   : > { %9166 = vmatpush3.msra.mxu1 %v1379_v49  ;;  %9159 = vmatmul.mubr.f32.vlgmr.msra.gmra.mxu0 %v1330_v51  ;;  %v1910_v12 = vsub.f32 %v10524_v63, %v10550_v7 }
  0x61   : > { %9167 = vmatprep.subr.mxu1 %v1386_v52  ;;  %9172 = vmatprep.subr.mxu0 %v10397_v24  ;;  %v10719_v56 = vand.u32 4294901760, %v10699_v50 }
  0x62   : > { %9168 = vmatpush3.msra.mxu1 %v1386_v52  ;;  %9169 = vmatprep.mubr.f32.mxu1 %v10406_v27 }
  0x63   : > { %9173 = vmatpush3.msra.mxu0 %v10397_v24  ;;  %9170 = vmatmul.mubr.f32.vlgmr.msra.gmra.mxu1 %v10413_v29  ;;  %v1925_v24 = vand.u32 4294901760, %v1924_v19  ;;  %v2477_v62 = vsub.f32 %v10699_v50, %v10719_v56 }
  0x64   : > { %9174 = vmatprep.subr.mxu0 %v10411_v28  ;;  %9183 = vmatprep.subr.mxu1 %v10378_v18 }
  0x65   : > { %9175 = vmatpush3.msra.mxu0 %v10411_v28  ;;  %9184 = vmatpush3.msra.mxu1 %v10378_v18  ;;  %v8430_v28 = vld [vmem:[%s12278_s1 + $0x98] sm:$0x3f] }
  0x66   : > { %9176 = vmatprep.subr.mxu0 %v10426_v32  ;;  %9185 = vmatprep.subr.mxu1 %v10388_v21 }
  0x67   : > { %9177 = vmatpush3.msra.mxu0 %v10426_v32  ;;  %9186 = vmatpush3.msra.mxu1 %v10388_v21 }
  0x68   : > { %9178 = vmatprep.subr.mxu0 %v10445_v36  ;;  %9187 = vmatprep.subr.mxu1 %v10399_v25 }
  0x69   : > { %9179 = vmatpush3.msra.mxu0 %v10445_v36  ;;  %9180 = vmatprep.mubr.f32.mxu0 %v10432_v33  ;;  %v2324_v33 = vld [vmem:[%s10218_s5 + $0xc] sm:$0xff] }
  0x6a   : > { %9188 = vmatpush3.msra.mxu1 %v10399_v25  ;;  %9181 = vmatmul.mubr.f32.vlgmr.msra.gmra.mxu0 %v10440_v35  ;;  %v2334_v37 = vsel %vm155_vm1, %v2324_v33, 0 }
  0x6b   : > { %9189 = vmatprep.subr.mxu1 %v10417_v30  ;;  %9194 = vmatprep.subr.mxu0 %v10423_v31  ;;  %v10667_v43 = vand.u32 4294901760, %v2334_v37 }
  0x6c   : > { %9190 = vmatpush3.msra.mxu1 %v10417_v30  ;;  %9191 = vmatprep.mubr.f32.mxu1 %v1318_v39 }
  0x6d   : > { %9195 = vmatpush3.msra.mxu0 %v10423_v31  ;;  %9192 = vmatmul.mubr.f32.vlgmr.msra.gmra.mxu1 %v1328_v41  ;;  %v2323_v31 = vld [vmem:[%s10218_s5 + $0x4] sm:$0xff]  ;;  %v10694_v49 = vsub.f32 %v2334_v37, %v10667_v43 }
  0x6e   : > { %9196 = vmatprep.subr.mxu0 %v10437_v34  ;;  %9205 = vmatprep.subr.mxu1 %v10378_v18  ;;  %v2331_v36 = vsel %vm155_vm1, %v2323_v31, 0 }
  0x6f   : > { %9197 = vmatpush3.msra.mxu0 %v10437_v34  ;;  %9206 = vmatpush3.msra.mxu1 %v10378_v18  ;;  %v1911_v18 = vand.u32 4294901760, %v1910_v12  ;;  %v8428_v34 = vld [vmem:[%s12278_s1 + $0x88] sm:$0xff]  ;;  %v10660_v41 = vand.u32 4294901760, %v2331_v36  ;;  %v2420_v55 = vand.u32 4294901760, %v10694_v49 }
  0x70   : > { %9198 = vmatprep.subr.mxu0 %v10452_v38  ;;  %9207 = vmatprep.subr.mxu1 %v10388_v21  ;;  %v10653_v39 = vand.u32 4294901760, %v8428_v34 }
  0x71   : > { %9199 = vmatpush3.msra.mxu0 %v10452_v38  ;;  %9208 = vmatpush3.msra.mxu1 %v10388_v21  ;;  %v1918_v21 = vand.u32 4294901760, %v1917_v15  ;;  %v10686_v47 = vsub.f32 %v2331_v36, %v10660_v41  ;;  %v2421_v61 = vsub.f32 %v10694_v49, %v2420_v55  ;;  %v8431_v15 = vld [vmem:[%s12278_s1 + $0xa0] sm:$0xff] }
  0x72   : > { %9200 = vmatprep.subr.mxu0 %v10465_v42  ;;  %9209 = vmatprep.subr.mxu1 %v10399_v25  ;;  %v10680_v46 = vsub.f32 %v8428_v34, %v10653_v39  ;;  %v10798_v19 = vand.u32 4294901760, %v8431_v15 }
  0x73   : > { %9201 = vmatpush3.msra.mxu0 %v10465_v42  ;;  %9202 = vmatprep.mubr.f32.mxu0 %v10406_v27  ;;  %v2410_v53 = vand.u32 4294901760, %v10686_v47  ;;  %v2422_v1 = vand.u32 4294901760, %v2421_v61 }
  0x74   : > { %9210 = vmatpush3.msra.mxu1 %v10399_v25  ;;  %9203 = vmatmul.mubr.f32.vlgmr.msra.gmra.mxu0 %v10413_v29  ;;  %v1866_v25 = vand.u32 4294901760, %v1865_v20  ;;  %v10706_v52 = vand.u32 4294901760, %v10680_v46 }
  0x75   : > { %9211 = vmatprep.subr.mxu1 %v10417_v30  ;;  %9216 = vmatprep.subr.mxu0 %v10505_v57  ;;  %v2411_v59 = vsub.f32 %v10686_v47, %v2410_v53 }
  0x76   : > { %9212 = vmatpush3.msra.mxu1 %v10417_v30  ;;  %9213 = vmatprep.mubr.f32.mxu1 %v10406_v27  ;;  %v1932_v27 = vand.u32 4294901760, %v1931_v23  ;;  %v8429_v30 = vld [vmem:[%s12278_s1 + $0x90] sm:$0xff]  ;;  %v2470_v58 = vsub.f32 %v10680_v46, %v10706_v52 }
  0x77   : > { %9217 = vmatpush3.msra.mxu0 %v10505_v57  ;;  %9214 = vmatmul.mubr.f32.vlgmr.msra.gmra.mxu1 %v10413_v29  ;;  %v2337_v29 = vsel %vm162_vm0, %v8430_v28, 0  ;;  %v10642_v35 = vand.u32 4294901760, %v8429_v30 }
  0x78   : > { %9218 = vmatprep.subr.mxu0 %v10515_v60  ;;  %9227 = vmatprep.subr.mxu1 %v1911_v18  ;;  %v10632_v32 = vand.u32 4294901760, %v2337_v29 }
  0x79   : > { %9219 = vmatpush3.msra.mxu0 %v10515_v60  ;;  %9228 = vmatpush3.msra.mxu1 %v1911_v18  ;;  %v10665_v42 = vsub.f32 %v8429_v30, %v10642_v35 }
  0x7a   : > { %9220 = vmatprep.subr.mxu0 %v10526_v0  ;;  %9229 = vmatprep.subr.mxu1 %v1918_v21  ;;  %v10651_v38 = vsub.f32 %v2337_v29, %v10632_v32 }
  0x7b   : > { %9221 = vmatpush3.msra.mxu0 %v10526_v0  ;;  %9230 = vmatpush3.msra.mxu1 %v1918_v21  ;;  %v10691_v48 = vand.u32 4294901760, %v10665_v42 }
  0x7c   : > { %9222 = vmatprep.subr.mxu0 %v10544_v6  ;;  %9231 = vmatprep.subr.mxu1 %v1925_v24  ;;  %v10677_v45 = vand.u32 4294901760, %v10651_v38 }
  0x7d   : > { %9223 = vmatpush3.msra.mxu0 %v10544_v6  ;;  %9224 = vmatprep.mubr.f32.mxu0 %v1866_v25  ;;  %v2463_v54 = vsub.f32 %v10665_v42, %v10691_v48  ;;  %v10826_v25 = vsub.f32 %v8431_v15, %v10798_v19 }
  0x7e   : > { %9232 = vmatpush3.msra.mxu1 %v1925_v24  ;;  %9225 = vmatmul.mubr.f32.vlgmr.msra.gmra.mxu0 %v1876_v26  ;;  %v2456_v51 = vsub.f32 %v10651_v38, %v10677_v45 }
  0x7f   : > { %9233 = vmatprep.subr.mxu1 %v1932_v27  ;;  %9238 = vmatprep.subr.mxu0 %v10524_v63  ;;  %v10846_v31 = vand.u32 4294901760, %v10826_v25 }
  0x80   : > { %9234 = vmatpush3.msra.mxu1 %v1932_v27  ;;  %9235 = vmatprep.mubr.f32.mxu1 %v10533_v2 }
  0x81   : > { %9239 = vmatpush3.msra.mxu0 %v10524_v63  ;;  %9236 = vmatmul.mubr.f32.vlgmr.msra.gmra.mxu1 %v10540_v4  ;;  %v2471_v63 = vand.u32 4294901760, %v2470_v58  ;;  %v3023_v37 = vsub.f32 %v10826_v25, %v10846_v31 }
  0x82   : > { %9240 = vmatprep.subr.mxu0 %v10538_v3  ;;  %9249 = vmatprep.subr.mxu1 %v10505_v57 }
  0x83   : > { %9241 = vmatpush3.msra.mxu0 %v10538_v3  ;;  %9250 = vmatpush3.msra.mxu1 %v10505_v57  ;;  %v8434_v3 = vld [vmem:[%s12278_s1 + $0xb8] sm:$0x3f] }
  0x84   : > { %9242 = vmatprep.subr.mxu0 %v10553_v9  ;;  %9251 = vmatprep.subr.mxu1 %v10515_v60 }
  0x85   : > { %9243 = vmatpush3.msra.mxu0 %v10553_v9  ;;  %9252 = vmatpush3.msra.mxu1 %v10515_v60 }
  0x86   : > { %9244 = vmatprep.subr.mxu0 %v10572_v8  ;;  %9253 = vmatprep.subr.mxu1 %v10526_v0 }
  0x87   : > { %9245 = vmatpush3.msra.mxu0 %v10572_v8  ;;  %9246 = vmatprep.mubr.f32.mxu0 %v10559_v5  ;;  %v2870_v5 = vld [vmem:[%s10218_s5 + $0xd] sm:$0xff] }
  0x88   : > { %9254 = vmatpush3.msra.mxu1 %v10526_v0  ;;  %9247 = vmatmul.mubr.f32.vlgmr.msra.gmra.mxu0 %v10567_v11  ;;  %v2880_v12 = vsel %vm155_vm1, %v2870_v5, 0 }
  0x89   : > { %9255 = vmatprep.subr.mxu1 %v10544_v6  ;;  %9260 = vmatprep.subr.mxu0 %v10550_v7  ;;  %v10794_v18 = vand.u32 4294901760, %v2880_v12 }
  0x8a   : > { %9256 = vmatpush3.msra.mxu1 %v10544_v6  ;;  %9257 = vmatprep.mubr.f32.mxu1 %v1864_v14 }
  0x8b   : > { %9261 = vmatpush3.msra.mxu0 %v10550_v7  ;;  %9258 = vmatmul.mubr.f32.vlgmr.msra.gmra.mxu1 %v1874_v16  ;;  %v2869_v7 = vld [vmem:[%s10218_s5 + $0x5] sm:$0xff]  ;;  %v10821_v24 = vsub.f32 %v2880_v12, %v10794_v18 }
  0x8c   : > { %9262 = vmatprep.subr.mxu0 %v10564_v10  ;;  %9271 = vmatprep.subr.mxu1 %v10505_v57  ;;  %v2877_v8 = vsel %vm155_vm1, %v2869_v7, 0 }
  0x8d   : > { %9263 = vmatpush3.msra.mxu0 %v10564_v10  ;;  %9272 = vmatpush3.msra.mxu1 %v10505_v57  ;;  %v2457_v57 = vand.u32 4294901760, %v2456_v51  ;;  %v8432_v10 = vld [vmem:[%s12278_s1 + $0xa8] sm:$0xff]  ;;  %v10787_v16 = vand.u32 4294901760, %v2877_v8  ;;  %v2966_v30 = vand.u32 4294901760, %v10821_v24 }
  0x8e   : > { %9264 = vmatprep.subr.mxu0 %v10579_v13  ;;  %9273 = vmatprep.subr.mxu1 %v10515_v60  ;;  %v10780_v14 = vand.u32 4294901760, %v8432_v10 }
  0x8f   : > { %9265 = vmatpush3.msra.mxu0 %v10579_v13  ;;  %9274 = vmatpush3.msra.mxu1 %v10515_v60  ;;  %v2464_v60 = vand.u32 4294901760, %v2463_v54  ;;  %v10813_v22 = vsub.f32 %v2877_v8, %v10787_v16  ;;  %v2967_v36 = vsub.f32 %v10821_v24, %v2966_v30  ;;  %v8435_v54 = vld [vmem:[%s12278_s1 + $0xc0] sm:$0xff] }
  0x90   : > { %9266 = vmatprep.subr.mxu0 %v10592_v17  ;;  %9275 = vmatprep.subr.mxu1 %v10526_v0  ;;  %v10807_v21 = vsub.f32 %v8432_v10, %v10780_v14  ;;  %v10925_v58 = vand.u32 4294901760, %v8435_v54 }
  0x91   : > { %9267 = vmatpush3.msra.mxu0 %v10592_v17  ;;  %9268 = vmatprep.mubr.f32.mxu0 %v10533_v2  ;;  %v2956_v28 = vand.u32 4294901760, %v10813_v22  ;;  %v2968_v40 = vand.u32 4294901760, %v2967_v36 }
  0x92   : > { %9276 = vmatpush3.msra.mxu1 %v10526_v0  ;;  %9269 = vmatmul.mubr.f32.vlgmr.msra.gmra.mxu0 %v10540_v4  ;;  %v2412_v0 = vand.u32 4294901760, %v2411_v59  ;;  %v10833_v27 = vand.u32 4294901760, %v10807_v21 }
  0x93   : > { %9277 = vmatprep.subr.mxu1 %v10544_v6  ;;  %9282 = vmatprep.subr.mxu0 %v10632_v32  ;;  %v2957_v34 = vsub.f32 %v10813_v22, %v2956_v28 }
  0x94   : > { %9278 = vmatpush3.msra.mxu1 %v10544_v6  ;;  %9279 = vmatprep.mubr.f32.mxu1 %v10533_v2  ;;  %v2478_v2 = vand.u32 4294901760, %v2477_v62  ;;  %v8433_v6 = vld [vmem:[%s12278_s1 + $0xb0] sm:$0xff]  ;;  %v3016_v33 = vsub.f32 %v10807_v21, %v10833_v27 }
  0x95   : > { %9283 = vmatpush3.msra.mxu0 %v10632_v32  ;;  %9280 = vmatmul.mubr.f32.vlgmr.msra.gmra.mxu1 %v10540_v4  ;;  %v2883_v4 = vsel %vm162_vm0, %v8434_v3, 0  ;;  %v10769_v11 = vand.u32 4294901760, %v8433_v6 }
  0x96   : > { %9284 = vmatprep.subr.mxu0 %v10642_v35  ;;  %9293 = vmatprep.subr.mxu1 %v2457_v57  ;;  %v10759_v9 = vand.u32 4294901760, %v2883_v4 }
  0x97   : > { %9285 = vmatpush3.msra.mxu0 %v10642_v35  ;;  %9294 = vmatpush3.msra.mxu1 %v2457_v57  ;;  %v10792_v17 = vsub.f32 %v8433_v6, %v10769_v11 }
  0x98   : > { %9286 = vmatprep.subr.mxu0 %v10653_v39  ;;  %9295 = vmatprep.subr.mxu1 %v2464_v60  ;;  %v10778_v13 = vsub.f32 %v2883_v4, %v10759_v9 }
  0x99   : > { %9287 = vmatpush3.msra.mxu0 %v10653_v39  ;;  %9296 = vmatpush3.msra.mxu1 %v2464_v60  ;;  %v10818_v23 = vand.u32 4294901760, %v10792_v17 }
  0x9a   : > { %9288 = vmatprep.subr.mxu0 %v10671_v44  ;;  %9297 = vmatprep.subr.mxu1 %v2471_v63  ;;  %v10804_v20 = vand.u32 4294901760, %v10778_v13 }
  0x9b   : > { %9289 = vmatpush3.msra.mxu0 %v10671_v44  ;;  %9290 = vmatprep.mubr.f32.mxu0 %v2412_v0  ;;  %v3009_v29 = vsub.f32 %v10792_v17, %v10818_v23  ;;  %v10953_v0 = vsub.f32 %v8435_v54, %v10925_v58 }
  0x9c   : > { %9298 = vmatpush3.msra.mxu1 %v2471_v63  ;;  %9291 = vmatmul.mubr.f32.vlgmr.msra.gmra.mxu0 %v2422_v1  ;;  %v3002_v26 = vsub.f32 %v10778_v13, %v10804_v20 }
  0x9d   : > { %9299 = vmatprep.subr.mxu1 %v2478_v2  ;;  %9304 = vmatprep.subr.mxu0 %v10651_v38  ;;  %v10973_v7 = vand.u32 4294901760, %v10953_v0 }
  0x9e   : > { %9300 = vmatpush3.msra.mxu1 %v2478_v2  ;;  %9301 = vmatprep.mubr.f32.mxu1 %v10660_v41 }
  0x9f   : > { %9305 = vmatpush3.msra.mxu0 %v10651_v38  ;;  %9302 = vmatmul.mubr.f32.vlgmr.msra.gmra.mxu1 %v10667_v43  ;;  %v3017_v38 = vand.u32 4294901760, %v3016_v33  ;;  %v3569_v12 = vsub.f32 %v10953_v0, %v10973_v7 }
  0xa0   : > { %9306 = vmatprep.subr.mxu0 %v10665_v42  ;;  %9315 = vmatprep.subr.mxu1 %v10632_v32 }
  0xa1   : > { %9307 = vmatpush3.msra.mxu0 %v10665_v42  ;;  %9316 = vmatpush3.msra.mxu1 %v10632_v32  ;;  %v8438_v42 = vld [vmem:[%s12278_s1 + $0xd8] sm:$0x3f] }
  0xa2   : > { %9308 = vmatprep.subr.mxu0 %v10680_v46  ;;  %9317 = vmatprep.subr.mxu1 %v10642_v35 }
  0xa3   : > { %9309 = vmatpush3.msra.mxu0 %v10680_v46  ;;  %9318 = vmatpush3.msra.mxu1 %v10642_v35 }
  0xa4   : > { %9310 = vmatprep.subr.mxu0 %v10699_v50  ;;  %9319 = vmatprep.subr.mxu1 %v10653_v39 }
  0xa5   : > { %9311 = vmatpush3.msra.mxu0 %v10699_v50  ;;  %9312 = vmatprep.mubr.f32.mxu0 %v10686_v47  ;;  %v3416_v47 = vld [vmem:[%s10218_s5 + $0xe] sm:$0xff] }
  0xa6   : > { %9320 = vmatpush3.msra.mxu1 %v10653_v39  ;;  %9313 = vmatmul.mubr.f32.vlgmr.msra.gmra.mxu0 %v10694_v49  ;;  %v3426_v51 = vsel %vm155_vm1, %v3416_v47, 0 }
  0xa7   : > { %9321 = vmatprep.subr.mxu1 %v10671_v44  ;;  %9326 = vmatprep.subr.mxu0 %v10677_v45  ;;  %v10921_v57 = vand.u32 4294901760, %v3426_v51 }
  0xa8   : > { %9322 = vmatpush3.msra.mxu1 %v10671_v44  ;;  %9323 = vmatprep.mubr.f32.mxu1 %v2410_v53 }
  0xa9   : > { %9327 = vmatpush3.msra.mxu0 %v10677_v45  ;;  %9324 = vmatmul.mubr.f32.vlgmr.msra.gmra.mxu1 %v2420_v55  ;;  %v3415_v45 = vld [vmem:[%s10218_s5 + $0x6] sm:$0xff]  ;;  %v10948_v63 = vsub.f32 %v3426_v51, %v10921_v57 }
  0xaa   : > { %9328 = vmatprep.subr.mxu0 %v10691_v48  ;;  %9337 = vmatprep.subr.mxu1 %v10632_v32  ;;  %v3423_v50 = vsel %vm155_vm1, %v3415_v45, 0 }
  0xab   : > { %9329 = vmatpush3.msra.mxu0 %v10691_v48  ;;  %9338 = vmatpush3.msra.mxu1 %v10632_v32  ;;  %v3003_v32 = vand.u32 4294901760, %v3002_v26  ;;  %v8436_v48 = vld [vmem:[%s12278_s1 + $0xc8] sm:$0xff]  ;;  %v10914_v55 = vand.u32 4294901760, %v3423_v50  ;;  %v3512_v6 = vand.u32 4294901760, %v10948_v63 }
  0xac   : > { %9330 = vmatprep.subr.mxu0 %v10706_v52  ;;  %9339 = vmatprep.subr.mxu1 %v10642_v35  ;;  %v10907_v53 = vand.u32 4294901760, %v8436_v48 }
  0xad   : > { %9331 = vmatpush3.msra.mxu0 %v10706_v52  ;;  %9340 = vmatpush3.msra.mxu1 %v10642_v35  ;;  %v3010_v35 = vand.u32 4294901760, %v3009_v29  ;;  %v10940_v61 = vsub.f32 %v3423_v50, %v10914_v55  ;;  %v3513_v8 = vsub.f32 %v10948_v63, %v3512_v6  ;;  %v8439_v29 = vld [vmem:[%s12278_s1 + $0xe0] sm:$0xff] }
  0xae   : > { %9332 = vmatprep.subr.mxu0 %v10719_v56  ;;  %9341 = vmatprep.subr.mxu1 %v10653_v39  ;;  %v10934_v60 = vsub.f32 %v8436_v48, %v10907_v53  ;;  %v11052_v33 = vand.u32 4294901760, %v8439_v29 }
  0xaf   : > { %9333 = vmatpush3.msra.mxu0 %v10719_v56  ;;  %9334 = vmatprep.mubr.f32.mxu0 %v10660_v41  ;;  %v3502_v3 = vand.u32 4294901760, %v10940_v61  ;;  %v3514_v15 = vand.u32 4294901760, %v3513_v8 }
  0xb0   : > { %9342 = vmatpush3.msra.mxu1 %v10653_v39  ;;  %9335 = vmatmul.mubr.f32.vlgmr.msra.gmra.mxu0 %v10667_v43  ;;  %v2958_v39 = vand.u32 4294901760, %v2957_v34  ;;  %v10960_v2 = vand.u32 4294901760, %v10934_v60 }
  0xb1   : > { %9343 = vmatprep.subr.mxu1 %v10671_v44  ;;  %9348 = vmatprep.subr.mxu0 %v10759_v9  ;;  %v3503_v10 = vsub.f32 %v10940_v61, %v3502_v3 }
  0xb2   : > { %9344 = vmatpush3.msra.mxu1 %v10671_v44  ;;  %9345 = vmatprep.mubr.f32.mxu1 %v10660_v41  ;;  %v3024_v41 = vand.u32 4294901760, %v3023_v37  ;;  %v8437_v44 = vld [vmem:[%s12278_s1 + $0xd0] sm:$0xff]  ;;  %v3562_v5 = vsub.f32 %v10934_v60, %v10960_v2 }
  0xb3   : > { %9349 = vmatpush3.msra.mxu0 %v10759_v9  ;;  %9346 = vmatmul.mubr.f32.vlgmr.msra.gmra.mxu1 %v10667_v43  ;;  %v3429_v43 = vsel %vm162_vm0, %v8438_v42, 0  ;;  %v10896_v49 = vand.u32 4294901760, %v8437_v44 }
  0xb4   : > { %9350 = vmatprep.subr.mxu0 %v10769_v11  ;;  %9359 = vmatprep.subr.mxu1 %v3003_v32  ;;  %v10886_v46 = vand.u32 4294901760, %v3429_v43 }
  0xb5   : > { %9351 = vmatpush3.msra.mxu0 %v10769_v11  ;;  %9360 = vmatpush3.msra.mxu1 %v3003_v32  ;;  %v10919_v56 = vsub.f32 %v8437_v44, %v10896_v49 }
  0xb6   : > { %9352 = vmatprep.subr.mxu0 %v10780_v14  ;;  %9361 = vmatprep.subr.mxu1 %v3010_v35  ;;  %v10905_v52 = vsub.f32 %v3429_v43, %v10886_v46 }
  0xb7   : > { %9353 = vmatpush3.msra.mxu0 %v10780_v14  ;;  %9362 = vmatpush3.msra.mxu1 %v3010_v35  ;;  %v10945_v62 = vand.u32 4294901760, %v10919_v56 }
  0xb8   : > { %9354 = vmatprep.subr.mxu0 %v10798_v19  ;;  %9363 = vmatprep.subr.mxu1 %v3017_v38  ;;  %v10931_v59 = vand.u32 4294901760, %v10905_v52 }
  0xb9   : > { %9355 = vmatpush3.msra.mxu0 %v10798_v19  ;;  %9356 = vmatprep.mubr.f32.mxu0 %v2958_v39  ;;  %v3555_v4 = vsub.f32 %v10919_v56, %v10945_v62 }
  0xba   : > { %9364 = vmatpush3.msra.mxu1 %v3017_v38  ;;  %9357 = vmatmul.mubr.f32.vlgmr.msra.gmra.mxu0 %v2968_v40  ;;  %v3548_v1 = vsub.f32 %v10905_v52, %v10931_v59  ;;  %v11080_v40 = vsub.f32 %v8439_v29, %v11052_v33 }
  0xbb   : > { %9365 = vmatprep.subr.mxu1 %v3024_v41  ;;  %9370 = vmatprep.subr.mxu0 %v10778_v13 }
  0xbc   : > { %9366 = vmatpush3.msra.mxu1 %v3024_v41  ;;  %9367 = vmatprep.mubr.f32.mxu1 %v10787_v16 }
  0xbd   : > { %9371 = vmatpush3.msra.mxu0 %v10778_v13  ;;  %9368 = vmatmul.mubr.f32.vlgmr.msra.gmra.mxu1 %v10794_v18  ;;  %v3563_v13 = vand.u32 4294901760, %v3562_v5 }
  0xbe   : > { %9372 = vmatprep.subr.mxu0 %v10792_v17  ;;  %9381 = vmatprep.subr.mxu1 %v10759_v9 }
  0xbf   : > { %9373 = vmatpush3.msra.mxu0 %v10792_v17  ;;  %9382 = vmatpush3.msra.mxu1 %v10759_v9  ;;  %v8442_v17 = vld [vmem:[%s12278_s1 + $0xf8] sm:$0x3f] }
  0xc0   : > { %9374 = vmatprep.subr.mxu0 %v10807_v21  ;;  %9383 = vmatprep.subr.mxu1 %v10769_v11 }
  0xc1   : > { %9375 = vmatpush3.msra.mxu0 %v10807_v21  ;;  %9384 = vmatpush3.msra.mxu1 %v10769_v11 }
  0xc2   : > { %9376 = vmatprep.subr.mxu0 %v10826_v25  ;;  %9385 = vmatprep.subr.mxu1 %v10780_v14 }
  0xc3   : > { %9377 = vmatpush3.msra.mxu0 %v10826_v25  ;;  %9378 = vmatprep.mubr.f32.mxu0 %v10813_v22  ;;  %v3962_v22 = vld [vmem:[%s10218_s5 + $0xf] sm:$0xff] }
  0xc4   : > { %9386 = vmatpush3.msra.mxu1 %v10780_v14  ;;  %9379 = vmatmul.mubr.f32.vlgmr.msra.gmra.mxu0 %v10821_v24  ;;  %v3972_v26 = vsel %vm155_vm1, %v3962_v22, 0 }
  0xc5   : > { %9387 = vmatprep.subr.mxu1 %v10798_v19  ;;  %9392 = vmatprep.subr.mxu0 %v10804_v20  ;;  %v11048_v32 = vand.u32 4294901760, %v3972_v26 }
  0xc6   : > { %9388 = vmatpush3.msra.mxu1 %v10798_v19  ;;  %9389 = vmatprep.mubr.f32.mxu1 %v2956_v28 }
  0xc7   : > { %9393 = vmatpush3.msra.mxu0 %v10804_v20  ;;  %9390 = vmatmul.mubr.f32.vlgmr.msra.gmra.mxu1 %v2966_v30  ;;  %v3961_v20 = vld [vmem:[%s10218_s5 + $0x7] sm:$0xff]  ;;  %v11075_v38 = vsub.f32 %v3972_v26, %v11048_v32 }
  0xc8   : > { %9394 = vmatprep.subr.mxu0 %v10818_v23  ;;  %9403 = vmatprep.subr.mxu1 %v10759_v9  ;;  %v3969_v25 = vsel %vm155_vm1, %v3961_v20, 0 }
  0xc9   : > { %9395 = vmatpush3.msra.mxu0 %v10818_v23  ;;  %9404 = vmatpush3.msra.mxu1 %v10759_v9  ;;  %v3549_v9 = vand.u32 4294901760, %v3548_v1  ;;  %v8440_v23 = vld [vmem:[%s12278_s1 + $0xe8] sm:$0xff]  ;;  %v11041_v30 = vand.u32 4294901760, %v3969_v25  ;;  %v4058_v50 = vand.u32 4294901760, %v11075_v38 }
  0xca   : > { %9396 = vmatprep.subr.mxu0 %v10833_v27  ;;  %9405 = vmatprep.subr.mxu1 %v10769_v11  ;;  %v11034_v28 = vand.u32 4294901760, %v8440_v23 }
  0xcb   : > { %9397 = vmatpush3.msra.mxu0 %v10833_v27  ;;  %9406 = vmatpush3.msra.mxu1 %v10769_v11  ;;  %v3556_v11 = vand.u32 4294901760, %v3555_v4  ;;  %v11067_v36 = vsub.f32 %v3969_v25, %v11041_v30 }
  0xcc   : > { %9398 = vmatprep.subr.mxu0 %v10846_v31  ;;  %9407 = vmatprep.subr.mxu1 %v10780_v14  ;;  %v11061_v35 = vsub.f32 %v8440_v23, %v11034_v28 }
  0xcd   : > { %9399 = vmatpush3.msra.mxu0 %v10846_v31  ;;  %9400 = vmatprep.mubr.f32.mxu0 %v10787_v16 }
  0xce   : > { %9408 = vmatpush3.msra.mxu1 %v10780_v14  ;;  %9401 = vmatmul.mubr.f32.vlgmr.msra.gmra.mxu0 %v10794_v18  ;;  %v3504_v14 = vand.u32 4294901760, %v3503_v10  ;;  %v11087_v43 = vand.u32 4294901760, %v11061_v35  ;;  %v8445_v10 = vld [vmem:[%s12278_s1 + $0x110] sm:$0xff] }
  0xcf   : > { %9409 = vmatprep.subr.mxu1 %v10798_v19  ;;  %9414 = vmatprep.subr.mxu0 %v10886_v46 }
  0xd0   : > { %9410 = vmatpush3.msra.mxu1 %v10798_v19  ;;  %9411 = vmatprep.mubr.f32.mxu1 %v10787_v16  ;;  %v3570_v16 = vand.u32 4294901760, %v3569_v12  ;;  %v8441_v19 = vld [vmem:[%s12278_s1 + $0xf0] sm:$0xff]  ;;  %v4108_v54 = vsub.f32 %v11061_v35, %v11087_v43 }
  0xd1   : > { %9415 = vmatpush3.msra.mxu0 %v10886_v46  ;;  %9412 = vmatmul.mubr.f32.vlgmr.msra.gmra.mxu1 %v10794_v18  ;;  %v3975_v18 = vsel %vm162_vm0, %v8442_v17, 0  ;;  %v11023_v24 = vand.u32 4294901760, %v8441_v19 }
  0xd2   : > { %9416 = vmatprep.subr.mxu0 %v10896_v49  ;;  %9425 = vmatprep.subr.mxu1 %v3549_v9  ;;  %v11013_v21 = vand.u32 4294901760, %v3975_v18 }
  0xd3   : > { %9417 = vmatpush3.msra.mxu0 %v10896_v49  ;;  %9426 = vmatpush3.msra.mxu1 %v3549_v9  ;;  %v11046_v31 = vsub.f32 %v8441_v19, %v11023_v24 }
  0xd4   : > { %9418 = vmatprep.subr.mxu0 %v10907_v53  ;;  %9427 = vmatprep.subr.mxu1 %v3556_v11  ;;  %v11032_v27 = vsub.f32 %v3975_v18, %v11013_v21  ;;  %v11150_v18 = vand.u32 4294901760, %v8445_v10 }
  0xd5   : > { %9419 = vmatpush3.msra.mxu0 %v10907_v53  ;;  %9428 = vmatpush3.msra.mxu1 %v3556_v11  ;;  %v11072_v37 = vand.u32 4294901760, %v11046_v31  ;;  %v4507_v11 = vld [vmem:[%s10218_s5 + $0x8] sm:$0xff] }
  0xd6   : > { %9420 = vmatprep.subr.mxu0 %v10925_v58  ;;  %9429 = vmatprep.subr.mxu1 %v3563_v13  ;;  %v11058_v34 = vand.u32 4294901760, %v11032_v27  ;;  %v4515_v19 = vsel %vm155_vm1, %v4507_v11, 0 }
  0xd7   : > { %9421 = vmatpush3.msra.mxu0 %v10925_v58  ;;  %9422 = vmatprep.mubr.f32.mxu0 %v3504_v14  ;;  %v4101_v48 = vsub.f32 %v11046_v31, %v11072_v37 }
  0xd8   : > { %9430 = vmatpush3.msra.mxu1 %v3563_v13  ;;  %9423 = vmatmul.mubr.f32.vlgmr.msra.gmra.mxu0 %v3514_v15  ;;  %v4094_v42 = vsub.f32 %v11032_v27, %v11058_v34  ;;  %v4508_v13 = vld [vmem:[%s10218_s5 + $0x10] sm:$0xff]  ;;  %v8444_v15 = vld [vmem:[%s12278_s1 + $0x108] sm:$0xff] }
  0xd9   : > { %9431 = vmatprep.subr.mxu1 %v3570_v16  ;;  %9436 = vmatprep.subr.mxu0 %v10905_v52  ;;  %v4518_v22 = vsel %vm155_vm1, %v4508_v13, 0  ;;  %v11161_v26 = vand.u32 4294901760, %v8444_v15  ;;  %v5054_v13 = vld [vmem:[%s10218_s5 + $0x11] sm:$0xff] }
  0xda   : > { %9432 = vmatpush3.msra.mxu1 %v3570_v16  ;;  %9433 = vmatprep.mubr.f32.mxu1 %v10914_v55 }
  0xdb   : > { %9437 = vmatpush3.msra.mxu0 %v10905_v52  ;;  %9434 = vmatmul.mubr.f32.vlgmr.msra.gmra.mxu1 %v10921_v57  ;;  %v11100_v52 = vand.u32 4294901760, %v11080_v40 }
  0xdc   : > { %9438 = vmatprep.subr.mxu0 %v10919_v56  ;;  %9447 = vmatprep.subr.mxu1 %v10886_v46 }
  0xdd   : > { %9439 = vmatpush3.msra.mxu0 %v10919_v56  ;;  %9448 = vmatpush3.msra.mxu1 %v10886_v46 }
  0xde   : > { %9440 = vmatprep.subr.mxu0 %v10934_v60  ;;  %9449 = vmatprep.subr.mxu1 %v10896_v49 }
  0xdf   : > { %9441 = vmatpush3.msra.mxu0 %v10934_v60  ;;  %9450 = vmatpush3.msra.mxu1 %v10896_v49 }
  0xe0   : > { %9442 = vmatprep.subr.mxu0 %v10953_v0  ;;  %9451 = vmatprep.subr.mxu1 %v10907_v53 }
  0xe1   : > { %9443 = vmatpush3.msra.mxu0 %v10953_v0  ;;  %9444 = vmatprep.mubr.f32.mxu0 %v10940_v61  ;;  %v4115_v61 = vsub.f32 %v11080_v40, %v11100_v52 }
  0xe2   : > { %9452 = vmatpush3.msra.mxu1 %v10907_v53  ;;  %9445 = vmatmul.mubr.f32.vlgmr.msra.gmra.mxu0 %v10948_v63 }
  0xe3   : > { %9453 = vmatprep.subr.mxu1 %v10925_v58  ;;  %9458 = vmatprep.subr.mxu0 %v10931_v59 }
  0xe4   : > { %9454 = vmatpush3.msra.mxu1 %v10925_v58  ;;  %9455 = vmatprep.mubr.f32.mxu1 %v3502_v3  ;;  %v4116_v3 = vand.u32 4294901760, %v4115_v61 }
  0xe5   : > { %9459 = vmatpush3.msra.mxu0 %v10931_v59  ;;  %9456 = vmatmul.mubr.f32.vlgmr.msra.gmra.mxu1 %v3512_v6  ;;  %v4102_v59 = vand.u32 4294901760, %v4101_v48  ;;  %v8446_v6 = vld [vmem:[%s12278_s1 + $0x118] sm:$0x3f] }
  0xe6   : > { %9460 = vmatprep.subr.mxu0 %v10945_v62  ;;  %9469 = vmatprep.subr.mxu1 %v10886_v46  ;;  %v9028_v39 = vpop.f32.mrf.mxu0  ;;  %v4521_v9 = vsel %vm162_vm0, %v8446_v6, 0 }
  0xe7   : > { %9461 = vmatpush3.msra.mxu0 %v10945_v62  ;;  %9470 = vmatpush3.msra.mxu1 %v10886_v46  ;;  %v9039_v41 = vpop.f32.mrf.mxu1  ;;  %v4048_v46 = vand.u32 4294901760, %v11067_v36  ;;  %v11140_v12 = vand.u32 4294901760, %v4521_v9 }
  0xe8   : > { %9462 = vmatprep.subr.mxu0 %v10960_v2  ;;  %9471 = vmatprep.subr.mxu1 %v10896_v49  ;;  %v349_v44 = vadd.f32 %v9039_v41, %v9028_v39  ;;  %v241_v45 = vpop.f32.mrf.mxu0  ;;  %v11175_v39 = vand.u32 4294901760, %v4518_v22 }
  0xe9   : > { %9463 = vmatpush3.msra.mxu0 %v10960_v2  ;;  %9472 = vmatpush3.msra.mxu1 %v10896_v49  ;;  %v342_v47 = vpop.f32.mrf.mxu1  ;;  %v4095_v49 = vand.u32 4294901760, %v4094_v42  ;;  %v4049_v56 = vsub.f32 %v11067_v36, %v4048_v46  ;;  %v11159_v25 = vsub.f32 %v4521_v9, %v11140_v12  ;;  %v11188_v42 = vsub.f32 %v8444_v15, %v11161_v26  ;;  %v8448_v15 = vld [vmem:[%s12278_s1 + $0x128] sm:$0xff] }
  0xea   : > { %9464 = vmatprep.subr.mxu0 %v10973_v7  ;;  %9473 = vmatprep.subr.mxu1 %v10907_v53  ;;  %v343_v51 = vadd.f32 %v342_v47, %v241_v45 }
  0xeb   : > { %9465 = vmatpush3.msra.mxu0 %v10973_v7  ;;  %9466 = vmatprep.mubr.f32.mxu0 %v10914_v55 }
  0xec   : > { %9474 = vmatpush3.msra.mxu1 %v10907_v53  ;;  %9467 = vmatmul.mubr.f32.vlgmr.msra.gmra.mxu0 %v10921_v57  ;;  %v4059_v53 = vsub.f32 %v11075_v38, %v4058_v50 }
  0xed   : > { %9475 = vmatprep.subr.mxu1 %v10925_v58  ;;  %9480 = vmatprep.subr.mxu0 %v11013_v21 }
  0xee   : > { %9476 = vmatpush3.msra.mxu1 %v10925_v58  ;;  %9477 = vmatprep.mubr.f32.mxu1 %v10914_v55  ;;  %v9050_v60 = vpop.f32.mrf.mxu0  ;;  %v4109_v58 = vand.u32 4294901760, %v4108_v54  ;;  %v4050_v55 = vand.u32 4294901760, %v4049_v56  ;;  %v4060_v2 = vand.u32 4294901760, %v4059_v53 }
  0xef   : > { %9481 = vmatpush3.msra.mxu0 %v11013_v21  ;;  %9478 = vmatmul.mubr.f32.vlgmr.msra.gmra.mxu1 %v10921_v57  ;;  %v436_v62 = vadd.f32 %v9050_v60, %v349_v44 }
  0xf0   : > { %9482 = vmatprep.subr.mxu0 %v11023_v24  ;;  %9491 = vmatprep.subr.mxu1 %v4095_v49  ;;  %v428_v63 = vpop.f32.mrf.mxu0 }
  0xf1   : > { %9483 = vmatpush3.msra.mxu0 %v11023_v24  ;;  %9492 = vmatpush3.msra.mxu1 %v4095_v49  ;;  %v429_v0 = vadd.f32 %v428_v63, %v343_v51  ;;  %v9061_v1 = vpop.f32.mrf.mxu1  ;;  %v11214_v49 = vand.u32 4294901760, %v11188_v42 }
  0xf2   : > { %9484 = vmatprep.subr.mxu0 %v11034_v28  ;;  %9493 = vmatprep.subr.mxu1 %v4102_v59  ;;  %v521_v57 = vadd.f32 %v9061_v1, %v436_v62 }
  0xf3   : > { %9485 = vmatpush3.msra.mxu0 %v11034_v28  ;;  %9494 = vmatpush3.msra.mxu1 %v4102_v59  ;;  %v512_v4 = vpop.f32.mrf.mxu1  ;;  %v4654_v60 = vsub.f32 %v11188_v42, %v11214_v49 }
  0xf4   : > { %9486 = vmatprep.subr.mxu0 %v11052_v33  ;;  %9495 = vmatprep.subr.mxu1 %v4109_v58  ;;  %v513_v7 = vadd.f32 %v512_v4, %v429_v0  ;;  %v8450_v4 = vld [vmem:[%s12278_s1 + $0x138] sm:$0x3f] }
  0xf5   : > { %9487 = vmatpush3.msra.mxu0 %v11052_v33  ;;  %9488 = vmatprep.mubr.f32.mxu0 %v4050_v55 }
  0xf6   : > { %9496 = vmatpush3.msra.mxu1 %v4109_v58  ;;  %9489 = vmatmul.mubr.f32.vlgmr.msra.gmra.mxu0 %v4060_v2 }
  0xf7   : > { %9497 = vmatprep.subr.mxu1 %v4116_v3  ;;  %9502 = vmatprep.subr.mxu0 %v11032_v27 }
  0xf8   : > { %9498 = vmatpush3.msra.mxu1 %v4116_v3  ;;  %9499 = vmatprep.mubr.f32.mxu1 %v11041_v30  ;;  %v9072_v5 = vpop.f32.mrf.mxu0 }
  0xf9   : > { %9503 = vmatpush3.msra.mxu0 %v11032_v27  ;;  %9500 = vmatmul.mubr.f32.vlgmr.msra.gmra.mxu1 %v11048_v32  ;;  %v610_v8 = vadd.f32 %v9072_v5, %v521_v57  ;;  %v8443_v27 = vld [vmem:[%s12278_s1 + $0x100] sm:$0xff]  ;;  %v8449_v5 = vld [vmem:[%s12278_s1 + $0x130] sm:$0xff] }
  0xfa   : > { %9504 = vmatprep.subr.mxu0 %v11046_v31  ;;  %9513 = vmatprep.subr.mxu1 %v11013_v21  ;;  %v603_v14 = vpop.f32.mrf.mxu0  ;;  %v11179_v41 = vand.u32 4294901760, %v8443_v27 }
  0xfb   : > { %9505 = vmatpush3.msra.mxu0 %v11046_v31  ;;  %9514 = vmatpush3.msra.mxu1 %v11013_v21  ;;  %v604_v16 = vadd.f32 %v603_v14, %v513_v7  ;;  %v9083_v17 = vpop.f32.mrf.mxu1  ;;  %v11168_v31 = vand.u32 4294901760, %v4515_v19  ;;  %v5067_v7 = vsel %vm162_vm0, %v8450_v4, 0 }
  0xfc   : > { %9506 = vmatprep.subr.mxu0 %v11061_v35  ;;  %9515 = vmatprep.subr.mxu1 %v11023_v24  ;;  %v691_v20 = vadd.f32 %v9083_v17, %v610_v8  ;;  %v11267_v8 = vand.u32 4294901760, %v5067_v7 }
  0xfd   : > { %9507 = vmatpush3.msra.mxu0 %v11061_v35  ;;  %9516 = vmatpush3.msra.mxu1 %v11023_v24  ;;  %v684_v23 = vpop.f32.mrf.mxu1  ;;  %v11173_v35 = vsub.f32 %v8445_v10, %v11150_v18  ;;  %v11194_v45 = vsub.f32 %v4515_v19, %v11168_v31  ;;  %v5053_v10 = vld [vmem:[%s10218_s5 + $0x9] sm:$0xff]  ;;  %v11277_v19 = vand.u32 4294901760, %v8449_v5 }
  0xfe   : > { %9508 = vmatprep.subr.mxu0 %v11080_v40  ;;  %9517 = vmatprep.subr.mxu1 %v11034_v28  ;;  %v685_v29 = vadd.f32 %v684_v23, %v604_v16  ;;  %v5064_v23 = vsel %vm155_vm1, %v5054_v13, 0  ;;  %v8452_v13 = vld [vmem:[%s12278_s1 + $0x148] sm:$0xff] }
  0xff   : > { %9509 = vmatpush3.msra.mxu0 %v11080_v40  ;;  %9510 = vmatprep.mubr.f32.mxu0 %v11067_v36  ;;  %v11185_v40 = vand.u32 4294901760, %v11159_v25  ;;  %v11199_v36 = vand.u32 4294901760, %v11173_v35 }
 0x100   : > { %9518 = vmatpush3.msra.mxu1 %v11034_v28  ;;  %9511 = vmatmul.mubr.f32.vlgmr.msra.gmra.mxu0 %v11075_v38 }
 0x101   : > { %9519 = vmatprep.subr.mxu1 %v11052_v33  ;;  %9524 = vmatprep.subr.mxu0 %v11058_v34  ;;  %v4640_v51 = vsub.f32 %v11159_v25, %v11185_v40  ;;  %v4647_v56 = vsub.f32 %v11173_v35, %v11199_v36 }
 0x102   : > { %9520 = vmatpush3.msra.mxu1 %v11052_v33  ;;  %9521 = vmatprep.mubr.f32.mxu1 %v4048_v46  ;;  %v9094_v44 = vpop.f32.mrf.mxu0  ;;  %v11202_v46 = vsub.f32 %v4518_v22, %v11175_v39 }
 0x103   : > { %9525 = vmatpush3.msra.mxu0 %v11058_v34  ;;  %9522 = vmatmul.mubr.f32.vlgmr.msra.gmra.mxu1 %v4058_v50  ;;  %v789_v47 = vadd.f32 %v9094_v44, %v691_v20  ;;  %v11207_v34 = vsub.f32 %v8443_v27, %v11179_v41  ;;  %v4648_v61 = vand.u32 4294901760, %v4647_v56  ;;  %v5061_v20 = vsel %vm155_vm1, %v5053_v10, 0  ;;  %v5600_v10 = vld [vmem:[%s10218_s5 + $0x12] sm:$0xff] }
 0x104   : > { %9526 = vmatprep.subr.mxu0 %v11072_v37  ;;  %9535 = vmatprep.subr.mxu1 %v11013_v21  ;;  %v778_v48 = vpop.f32.mrf.mxu0  ;;  %v4604_v59 = vand.u32 4294901760, %v11202_v46  ;;  %v11288_v27 = vsub.f32 %v5067_v7, %v11267_v8  ;;  %v5599_v7 = vld [vmem:[%s10218_s5 + $0xa] sm:$0xff] }
 0x105   : > { %9527 = vmatpush3.msra.mxu0 %v11072_v37  ;;  %9536 = vmatpush3.msra.mxu1 %v11013_v21  ;;  %v779_v38 = vadd.f32 %v778_v48, %v685_v29  ;;  %v9105_v50 = vpop.f32.mrf.mxu1  ;;  %v4594_v21 = vand.u32 4294901760, %v11194_v45  ;;  %v11290_v29 = vand.u32 4294901760, %v8448_v15  ;;  %v11306_v48 = vand.u32 4294901760, %v5064_v23 }
 0x106   : > { %9528 = vmatprep.subr.mxu0 %v11087_v43  ;;  %9537 = vmatprep.subr.mxu1 %v11023_v24  ;;  %v886_v54 = vadd.f32 %v9105_v50, %v789_v47  ;;  %v11304_v47 = vsub.f32 %v8449_v5, %v11277_v19 }
 0x107   : > { %9529 = vmatpush3.msra.mxu0 %v11087_v43  ;;  %9538 = vmatpush3.msra.mxu1 %v11023_v24  ;;  %v879_v37 = vpop.f32.mrf.mxu1  ;;  %v11227_v43 = vand.u32 4294901760, %v11207_v34  ;;  %v4641_v24 = vand.u32 4294901760, %v4640_v51  ;;  %v11319_v50 = vsub.f32 %v8448_v15, %v11290_v29 }
 0x108   : > { %9530 = vmatprep.subr.mxu0 %v11100_v52  ;;  %9539 = vmatprep.subr.mxu1 %v11034_v28  ;;  %v880_v53 = vadd.f32 %v879_v37, %v779_v38 }
 0x109   : > { %9531 = vmatpush3.msra.mxu0 %v11100_v52  ;;  %9532 = vmatprep.mubr.f32.mxu0 %v11041_v30  ;;  %v4595_v52 = vsub.f32 %v11194_v45, %v4594_v21  ;;  %v4661_v58 = vsub.f32 %v11207_v34, %v11227_v43  ;;  %v11345_v56 = vand.u32 4294901760, %v11319_v50 }
 0x10a   : > { %9540 = vmatpush3.msra.mxu1 %v11034_v28  ;;  %9533 = vmatmul.mubr.f32.vlgmr.msra.gmra.mxu0 %v11048_v32  ;;  %v4605_v28 = vsub.f32 %v11202_v46, %v4604_v59 }
 0x10b   : > { %9541 = vmatprep.subr.mxu1 %v11052_v33  ;;  %9546 = vmatprep.subr.mxu0 %v11140_v12  ;;  %v4662_v57 = vand.u32 4294901760, %v4661_v58 }
 0x10c   : > { %9542 = vmatpush3.msra.mxu1 %v11052_v33  ;;  %9543 = vmatprep.mubr.f32.mxu1 %v11041_v30  ;;  %v9116_v62 = vpop.f32.mrf.mxu0  ;;  %v4655_v33 = vand.u32 4294901760, %v4654_v60  ;;  %v4596_v30 = vand.u32 4294901760, %v4595_v52  ;;  %v4606_v2 = vand.u32 4294901760, %v4605_v28 }
 0x10d   : > { %9547 = vmatpush3.msra.mxu0 %v11140_v12  ;;  %9544 = vmatmul.mubr.f32.vlgmr.msra.gmra.mxu1 %v11048_v32  ;;  %v973_v63 = vadd.f32 %v9116_v62, %v886_v54 }
 0x10e   : > { %9548 = vmatprep.subr.mxu0 %v11150_v18  ;;  %9557 = vmatprep.subr.mxu1 %v4641_v24  ;;  %v965_v55 = vpop.f32.mrf.mxu0 }
 0x10f   : > { %9549 = vmatpush3.msra.mxu0 %v11150_v18  ;;  %9558 = vmatpush3.msra.mxu1 %v4641_v24  ;;  %v966_v0 = vadd.f32 %v965_v55, %v880_v53  ;;  %v9127_v1 = vpop.f32.mrf.mxu1 }
 0x110   : > { %9550 = vmatprep.subr.mxu0 %v11161_v26  ;;  %9559 = vmatprep.subr.mxu1 %v4648_v61  ;;  %v1058_v32 = vadd.f32 %v9127_v1, %v973_v63 }
 0x111   : > { %9551 = vmatpush3.msra.mxu0 %v11161_v26  ;;  %9560 = vmatpush3.msra.mxu1 %v4648_v61  ;;  %v1049_v3 = vpop.f32.mrf.mxu1  ;;  %v5200_v61 = vsub.f32 %v11319_v50, %v11345_v56 }
 0x112   : > { %9552 = vmatprep.subr.mxu0 %v11179_v41  ;;  %9561 = vmatprep.subr.mxu1 %v4655_v33  ;;  %v1050_v6 = vadd.f32 %v1049_v3, %v966_v0 }
 0x113   : > { %9553 = vmatpush3.msra.mxu0 %v11179_v41  ;;  %9554 = vmatprep.mubr.f32.mxu0 %v4596_v30 }
 0x114   : > { %9562 = vmatpush3.msra.mxu1 %v4655_v33  ;;  %9555 = vmatmul.mubr.f32.vlgmr.msra.gmra.mxu0 %v4606_v2 }
 0x115   : > { %9563 = vmatprep.subr.mxu1 %v4662_v57  ;;  %9568 = vmatprep.subr.mxu0 %v11159_v25 }
 0x116   : > { %9564 = vmatpush3.msra.mxu1 %v4662_v57  ;;  %9565 = vmatprep.mubr.f32.mxu1 %v11168_v31  ;;  %v9138_v9 = vpop.f32.mrf.mxu0 }
 0x117   : > { %9569 = vmatpush3.msra.mxu0 %v11159_v25  ;;  %9566 = vmatmul.mubr.f32.vlgmr.msra.gmra.mxu1 %v11175_v39  ;;  %v1147_v11 = vadd.f32 %v9138_v9, %v1058_v32  ;;  %v8454_v32 = vld [vmem:[%s12278_s1 + $0x158] sm:$0x3f] }
 0x118   : > { %9570 = vmatprep.subr.mxu0 %v11173_v35  ;;  %9579 = vmatprep.subr.mxu1 %v11140_v12  ;;  %v1140_v14 = vpop.f32.mrf.mxu0  ;;  %v5613_v3 = vsel %vm162_vm0, %v8454_v32, 0 }
 0x119   : > { %9571 = vmatpush3.msra.mxu0 %v11173_v35  ;;  %9580 = vmatpush3.msra.mxu1 %v11140_v12  ;;  %v1141_v16 = vadd.f32 %v1140_v14, %v1050_v6  ;;  %v9149_v17 = vpop.f32.mrf.mxu1  ;;  %v8447_v35 = vld [vmem:[%s12278_s1 + $0x120] sm:$0xff]  ;;  %v8453_v6 = vld [vmem:[%s12278_s1 + $0x150] sm:$0xff]  ;;  %v11398_v5 = vand.u32 4294901760, %v5613_v3 }
 0x11a   : > { %9572 = vmatprep.subr.mxu0 %v11188_v42  ;;  %9581 = vmatprep.subr.mxu1 %v11150_v18  ;;  %v11280_v22 = vadd.f32 %v9149_v17, %v1147_v11  ;;  %v11310_v38 = vand.u32 4294901760, %v8447_v35  ;;  %v5607_v17 = vsel %vm155_vm1, %v5599_v7, 0 }
 0x11b   : > { %9573 = vmatpush3.msra.mxu0 %v11188_v42  ;;  %9582 = vmatpush3.msra.mxu1 %v11150_v18  ;;  %v1221_v25 = vpop.f32.mrf.mxu1  ;;  %v11299_v42 = vand.u32 4294901760, %v5061_v20 }
 0x11c   : > { %9574 = vmatprep.subr.mxu0 %v11207_v34  ;;  %9583 = vmatprep.subr.mxu1 %v11161_v26  ;;  %v11295_v44 = vadd.f32 %v1221_v25, %v1141_v16  ;;  %v11408_v16 = vand.u32 4294901760, %v8453_v6 }
 0x11d   : > { %9575 = vmatpush3.msra.mxu0 %v11207_v34  ;;  %9576 = vmatprep.mubr.f32.mxu0 %v11194_v45  ;;  %v11316_v34 = vand.u32 4294901760, %v11288_v27  ;;  %v11325_v51 = vsub.f32 %v5061_v20, %v11299_v42  ;;  %v11330_v45 = vand.u32 4294901760, %v11304_v47 }
 0x11e   : > { %9584 = vmatpush3.msra.mxu1 %v11161_v26  ;;  %9577 = vmatmul.mubr.f32.vlgmr.msra.gmra.mxu0 %v11202_v46 }
 0x11f   : > { %9585 = vmatprep.subr.mxu1 %v11179_v41  ;;  %9590 = vmatprep.subr.mxu0 %v11185_v40  ;;  %v5186_v37 = vsub.f32 %v11288_v27, %v11316_v34  ;;  %v5193_v24 = vsub.f32 %v11304_v47, %v11330_v45 }
 0x120   : > { %9586 = vmatpush3.msra.mxu1 %v11179_v41  ;;  %9587 = vmatprep.mubr.f32.mxu1 %v4594_v21  ;;  %v9160_v54 = vpop.f32.mrf.mxu0  ;;  %v11333_v21 = vsub.f32 %v5064_v23, %v11306_v48  ;;  %v5610_v23 = vsel %vm155_vm1, %v5600_v10, 0  ;;  %v6146_v10 = vld [vmem:[%s10218_s5 + $0x13] sm:$0xff] }
 0x121   : > { %9591 = vmatpush3.msra.mxu0 %v11185_v40  ;;  %9588 = vmatmul.mubr.f32.vlgmr.msra.gmra.mxu1 %v4604_v59  ;;  %v11338_v40 = vsub.f32 %v8447_v35, %v11310_v38  ;;  %v5194_v28 = vand.u32 4294901760, %v5193_v24  ;;  %v11419_v35 = vand.u32 4294901760, %v8452_v13 }
 0x122   : > { %9592 = vmatprep.subr.mxu0 %v11199_v36  ;;  %9601 = vmatprep.subr.mxu1 %v11140_v12  ;;  %v5150_v60 = vand.u32 4294901760, %v11333_v21 }
 0x123   : > { %9593 = vmatpush3.msra.mxu0 %v11199_v36  ;;  %9602 = vmatpush3.msra.mxu1 %v11140_v12  ;;  %v9171_v46 = vpop.f32.mrf.mxu1  ;;  %v5140_v12 = vand.u32 4294901760, %v11325_v51  ;;  %v1322_v36 = vpop.f32.mrf.mxu0 }
 0x124   : > { %9594 = vmatprep.subr.mxu0 %v11214_v49  ;;  %9603 = vmatprep.subr.mxu1 %v11150_v18  ;;  %v1430_v59 = vadd.f32 %v9171_v46, %v9160_v54  ;;  %v11429_v46 = vand.u32 4294901760, %v5607_v17 }
 0x125   : > { %9595 = vmatpush3.msra.mxu0 %v11214_v49  ;;  %9604 = vmatpush3.msra.mxu1 %v11150_v18  ;;  %v1423_v53 = vpop.f32.mrf.mxu1  ;;  %v11358_v18 = vand.u32 4294901760, %v11338_v40  ;;  %v5187_v49 = vand.u32 4294901760, %v5186_v37  ;;  %v11434_v37 = vsub.f32 %v8453_v6, %v11408_v16  ;;  %v6145_v6 = vld [vmem:[%s10218_s5 + $0xb] sm:$0xff] }
 0x126   : > { %9596 = vmatprep.subr.mxu0 %v11227_v43  ;;  %9605 = vmatprep.subr.mxu1 %v11161_v26  ;;  %v1424_v52 = vadd.f32 %v1423_v53, %v1322_v36  ;;  %v11452_v53 = vsub.f32 %v8452_v13, %v11419_v35  ;;  %v8456_v13 = vld [vmem:[%s12278_s1 + $0x168] sm:$0xff] }
 0x127   : > { %9597 = vmatpush3.msra.mxu0 %v11227_v43  ;;  %9598 = vmatprep.mubr.f32.mxu0 %v11168_v31  ;;  %v5141_v43 = vsub.f32 %v11325_v51, %v5140_v12  ;;  %v5207_v58 = vsub.f32 %v11338_v40, %v11358_v18 }
 0x128   : > { %9606 = vmatpush3.msra.mxu1 %v11161_v26  ;;  %9599 = vmatmul.mubr.f32.vlgmr.msra.gmra.mxu0 %v11175_v39  ;;  %v5151_v26 = vsub.f32 %v11333_v21, %v5150_v60 }
 0x129   : > { %9607 = vmatprep.subr.mxu1 %v11179_v41  ;;  %9612 = vmatprep.subr.mxu0 %v11267_v8  ;;  %v5208_v1 = vand.u32 4294901760, %v5207_v58 }
 0x12a   : > { %9608 = vmatpush3.msra.mxu1 %v11179_v41  ;;  %9609 = vmatprep.mubr.f32.mxu1 %v11168_v31  ;;  %v9182_v62 = vpop.f32.mrf.mxu0  ;;  %v5201_v41 = vand.u32 4294901760, %v5200_v61  ;;  %v5142_v31 = vand.u32 4294901760, %v5141_v43  ;;  %v5152_v0 = vand.u32 4294901760, %v5151_v26 }
 0x12b   : > { %9613 = vmatpush3.msra.mxu0 %v11267_v8  ;;  %9610 = vmatmul.mubr.f32.vlgmr.msra.gmra.mxu1 %v11175_v39  ;;  %v1517_v63 = vadd.f32 %v9182_v62, %v1430_v59  ;;  %v11436_v59 = vand.u32 4294901760, %v5610_v23 }
 0x12c   : > { %9614 = vmatprep.subr.mxu0 %v11277_v19  ;;  %9623 = vmatprep.subr.mxu1 %v5187_v49  ;;  %v1509_v33 = vpop.f32.mrf.mxu0 }
 0x12d   : > { %9615 = vmatpush3.msra.mxu0 %v11277_v19  ;;  %9624 = vmatpush3.msra.mxu1 %v5187_v49  ;;  %v1510_v55 = vadd.f32 %v1509_v33, %v1424_v52  ;;  %v9193_v30 = vpop.f32.mrf.mxu1  ;;  %v11478_v52 = vand.u32 4294901760, %v11452_v53 }
 0x12e   : > { %9616 = vmatprep.subr.mxu0 %v11290_v29  ;;  %9625 = vmatprep.subr.mxu1 %v5194_v28  ;;  %v1602_v39 = vadd.f32 %v9193_v30, %v1517_v63 }
 0x12f   : > { %9617 = vmatpush3.msra.mxu0 %v11290_v29  ;;  %9626 = vmatpush3.msra.mxu1 %v5194_v28  ;;  %v1593_v2 = vpop.f32.mrf.mxu1  ;;  %v5746_v62 = vsub.f32 %v11452_v53, %v11478_v52 }
 0x130   : > { %9618 = vmatprep.subr.mxu0 %v11310_v38  ;;  %9627 = vmatprep.subr.mxu1 %v5201_v41  ;;  %v1594_v57 = vadd.f32 %v1593_v2, %v1510_v55  ;;  %v8458_v2 = vld [vmem:[%s12278_s1 + $0x178] sm:$0x3f] }
 0x131   : > { %9619 = vmatpush3.msra.mxu0 %v11310_v38  ;;  %9620 = vmatprep.mubr.f32.mxu0 %v5142_v31 }
 0x132   : > { %9628 = vmatpush3.msra.mxu1 %v5201_v41  ;;  %9621 = vmatmul.mubr.f32.vlgmr.msra.gmra.mxu0 %v5152_v0 }
 0x133   : > { %9629 = vmatprep.subr.mxu1 %v5208_v1  ;;  %9634 = vmatprep.subr.mxu0 %v11288_v27 }
 0x134   : > { %9630 = vmatpush3.msra.mxu1 %v5208_v1  ;;  %9631 = vmatprep.mubr.f32.mxu1 %v11299_v42  ;;  %v9204_v4 = vpop.f32.mrf.mxu0 }
 0x135   : > { %9635 = vmatpush3.msra.mxu0 %v11288_v27  ;;  %9632 = vmatmul.mubr.f32.vlgmr.msra.gmra.mxu1 %v11306_v48  ;;  %v1691_v9 = vadd.f32 %v9204_v4, %v1602_v39  ;;  %v11417_v27 = vsub.f32 %v5613_v3, %v11398_v5  ;;  %v8457_v4 = vld [vmem:[%s12278_s1 + $0x170] sm:$0xff] }
 0x136   : > { %9636 = vmatprep.subr.mxu0 %v11304_v47  ;;  %9645 = vmatprep.subr.mxu1 %v11267_v8  ;;  %v1684_v11 = vpop.f32.mrf.mxu0 }
 0x137   : > { %9637 = vmatpush3.msra.mxu0 %v11304_v47  ;;  %9646 = vmatpush3.msra.mxu1 %v11267_v8  ;;  %v1685_v14 = vadd.f32 %v1684_v11, %v1594_v57  ;;  %v9215_v15 = vpop.f32.mrf.mxu1  ;;  %v8451_v47 = vld [vmem:[%s12278_s1 + $0x140] sm:$0xff]  ;;  %v6159_v57 = vsel %vm162_vm0, %v8458_v2, 0 }
 0x138   : > { %9638 = vmatprep.subr.mxu0 %v11319_v50  ;;  %9647 = vmatprep.subr.mxu1 %v11277_v19  ;;  %v1772_v20 = vadd.f32 %v9215_v15, %v1691_v9  ;;  %v11531_v9 = vand.u32 4294901760, %v6159_v57 }
 0x139   : > { %9639 = vmatpush3.msra.mxu0 %v11319_v50  ;;  %9648 = vmatpush3.msra.mxu1 %v11277_v19  ;;  %v1765_v25 = vpop.f32.mrf.mxu1 }
 0x13a   : > { %9640 = vmatprep.subr.mxu0 %v11338_v40  ;;  %9649 = vmatprep.subr.mxu1 %v11290_v29  ;;  %v11425_v50 = vadd.f32 %v1772_v20, %v11280_v22  ;;  %v1766_v54 = vadd.f32 %v1765_v25, %v1685_v14  ;;  %v11443_v22 = vand.u32 4294901760, %v8451_v47  ;;  %v6153_v20 = vsel %vm155_vm1, %v6145_v6, 0 }
 0x13b   : > { %9641 = vmatpush3.msra.mxu0 %v11338_v40  ;;  %9642 = vmatprep.mubr.f32.mxu0 %v11325_v51  ;;  %v11449_v40 = vand.u32 4294901760, %v11417_v27  ;;  %v11463_v51 = vand.u32 4294901760, %v11434_v37  ;;  %v6156_v25 = vsel %vm155_vm1, %v6146_v10, 0  ;;  %v6692_v10 = vld [vmem:[%s10218_s5 + $0x14] sm:$0xff] }
 0x13c   : > { %9650 = vmatpush3.msra.mxu1 %v11290_v29  ;;  %9643 = vmatmul.mubr.f32.vlgmr.msra.gmra.mxu0 %v11333_v21  ;;  %v11439_v36 = vadd.f32 %v1766_v54, %v11295_v44  ;;  %v11458_v44 = vsub.f32 %v5607_v17, %v11429_v46  ;;  %v11541_v17 = vand.u32 4294901760, %v8457_v4  ;;  %v11552_v54 = vand.u32 4294901760, %v8456_v13 }
 0x13d   : > { %9651 = vmatprep.subr.mxu1 %v11310_v38  ;;  %9656 = vmatprep.subr.mxu0 %v11316_v34  ;;  %v5739_v43 = vsub.f32 %v11434_v37, %v11463_v51 }
 0x13e   : > { %9652 = vmatpush3.msra.mxu1 %v11310_v38  ;;  %9653 = vmatprep.mubr.f32.mxu1 %v5140_v12  ;;  %v9226_v24 = vpop.f32.mrf.mxu0  ;;  %v11466_v12 = vsub.f32 %v5610_v23, %v11436_v59 }
 0x13f   : > { %9657 = vmatpush3.msra.mxu0 %v11316_v34  ;;  %9654 = vmatmul.mubr.f32.vlgmr.msra.gmra.mxu1 %v5150_v60  ;;  %v11471_v34 = vsub.f32 %v8451_v47, %v11443_v22  ;;  %v5732_v60 = vsub.f32 %v11417_v27, %v11449_v40  ;;  %v5740_v58 = vand.u32 4294901760, %v5739_v43  ;;  %v11550_v47 = vsub.f32 %v6159_v57, %v11531_v9 }
 0x140   : > { %9658 = vmatprep.subr.mxu0 %v11330_v45  ;;  %9667 = vmatprep.subr.mxu1 %v11267_v8  ;;  %v5696_v28 = vand.u32 4294901760, %v11466_v12 }
 0x141   : > { %9659 = vmatpush3.msra.mxu0 %v11330_v45  ;;  %9668 = vmatpush3.msra.mxu1 %v11267_v8  ;;  %v9237_v21 = vpop.f32.mrf.mxu1  ;;  %v5686_v8 = vand.u32 4294901760, %v11458_v44  ;;  %v1868_v45 = vpop.f32.mrf.mxu0 }
 0x142   : > { %9660 = vmatprep.subr.mxu0 %v11345_v56  ;;  %9669 = vmatprep.subr.mxu1 %v11277_v19  ;;  %v1976_v49 = vadd.f32 %v9237_v21, %v9226_v24  ;;  %v11562_v21 = vand.u32 4294901760, %v6153_v20 }
 0x143   : > { %9661 = vmatpush3.msra.mxu0 %v11345_v56  ;;  %9670 = vmatpush3.msra.mxu1 %v11277_v19  ;;  %v1969_v61 = vpop.f32.mrf.mxu1  ;;  %v11491_v19 = vand.u32 4294901760, %v11471_v34  ;;  %v5733_v56 = vand.u32 4294901760, %v5732_v60  ;;  %v11567_v60 = vsub.f32 %v8457_v4, %v11541_v17  ;;  %v6691_v4 = vld [vmem:[%s10218_s5 + $0xc] sm:$0xff] }
 0x144   : > { %9662 = vmatprep.subr.mxu0 %v11358_v18  ;;  %9671 = vmatprep.subr.mxu1 %v11290_v29  ;;  %v1970_v26 = vadd.f32 %v1969_v61, %v1868_v45  ;;  %v11585_v61 = vsub.f32 %v8456_v13, %v11552_v54  ;;  %v8460_v13 = vld [vmem:[%s12278_s1 + $0x188] sm:$0xff] }
 0x145   : > { %9663 = vmatpush3.msra.mxu0 %v11358_v18  ;;  %9664 = vmatprep.mubr.f32.mxu0 %v11299_v42  ;;  %v5687_v18 = vsub.f32 %v11458_v44, %v5686_v8  ;;  %v5753_v41 = vsub.f32 %v11471_v34, %v11491_v19 }
 0x146   : > { %9672 = vmatpush3.msra.mxu1 %v11290_v29  ;;  %9665 = vmatmul.mubr.f32.vlgmr.msra.gmra.mxu0 %v11306_v48  ;;  %v5697_v29 = vsub.f32 %v11466_v12, %v5696_v28 }
 0x147   : > { %9673 = vmatprep.subr.mxu1 %v11310_v38  ;;  %9678 = vmatprep.subr.mxu0 %v11398_v5  ;;  %v5754_v39 = vand.u32 4294901760, %v5753_v41 }
 0x148   : > { %9674 = vmatpush3.msra.mxu1 %v11310_v38  ;;  %9675 = vmatprep.mubr.f32.mxu1 %v11299_v42  ;;  %v9248_v63 = vpop.f32.mrf.mxu0  ;;  %v5747_v38 = vand.u32 4294901760, %v5746_v62  ;;  %v5688_v42 = vand.u32 4294901760, %v5687_v18  ;;  %v5698_v0 = vand.u32 4294901760, %v5697_v29 }
 0x149   : > { %9679 = vmatpush3.msra.mxu0 %v11398_v5  ;;  %9676 = vmatmul.mubr.f32.vlgmr.msra.gmra.mxu1 %v11306_v48  ;;  %v2063_v33 = vadd.f32 %v9248_v63, %v1976_v49  ;;  %v11569_v49 = vand.u32 4294901760, %v6156_v25 }
 0x14a   : > { %9680 = vmatprep.subr.mxu0 %v11408_v16  ;;  %9689 = vmatprep.subr.mxu1 %v5733_v56  ;;  %v2055_v31 = vpop.f32.mrf.mxu0 }
 0x14b   : > { %9681 = vmatpush3.msra.mxu0 %v11408_v16  ;;  %9690 = vmatpush3.msra.mxu1 %v5733_v56  ;;  %v2056_v55 = vadd.f32 %v2055_v31, %v1970_v26  ;;  %v9259_v30 = vpop.f32.mrf.mxu1  ;;  %v11611_v26 = vand.u32 4294901760, %v11585_v61 }
 0x14c   : > { %9682 = vmatprep.subr.mxu0 %v11419_v35  ;;  %9691 = vmatprep.subr.mxu1 %v5740_v58  ;;  %v2148_v48 = vadd.f32 %v9259_v30, %v2063_v33 }
 0x14d   : > { %9683 = vmatpush3.msra.mxu0 %v11419_v35  ;;  %9692 = vmatpush3.msra.mxu1 %v5740_v58  ;;  %v2139_v1 = vpop.f32.mrf.mxu1  ;;  %v6292_v63 = vsub.f32 %v11585_v61, %v11611_v26 }
 0x14e   : > { %9684 = vmatprep.subr.mxu0 %v11443_v22  ;;  %9693 = vmatprep.subr.mxu1 %v5747_v38  ;;  %v2140_v32 = vadd.f32 %v2139_v1, %v2056_v55  ;;  %v8462_v1 = vld [vmem:[%s12278_s1 + $0x198] sm:$0x3f] }
 0x14f   : > { %9685 = vmatpush3.msra.mxu0 %v11443_v22  ;;  %9686 = vmatprep.mubr.f32.mxu0 %v5688_v42 }
 0x150   : > { %9694 = vmatpush3.msra.mxu1 %v5747_v38  ;;  %9687 = vmatmul.mubr.f32.vlgmr.msra.gmra.mxu0 %v5698_v0 }
 0x151   : > { %9695 = vmatprep.subr.mxu1 %v5754_v39  ;;  %9700 = vmatprep.subr.mxu0 %v11417_v27 }
 0x152   : > { %9696 = vmatpush3.msra.mxu1 %v5754_v39  ;;  %9697 = vmatprep.mubr.f32.mxu1 %v11429_v46  ;;  %v9270_v3 = vpop.f32.mrf.mxu0 }
 0x153   : > { %9701 = vmatpush3.msra.mxu0 %v11417_v27  ;;  %9698 = vmatmul.mubr.f32.vlgmr.msra.gmra.mxu1 %v11436_v59  ;;  %v2237_v7 = vadd.f32 %v9270_v3, %v2148_v48  ;;  %v8461_v3 = vld [vmem:[%s12278_s1 + $0x190] sm:$0xff] }
 0x154   : > { %9702 = vmatprep.subr.mxu0 %v11434_v37  ;;  %9711 = vmatprep.subr.mxu1 %v11398_v5  ;;  %v2230_v11 = vpop.f32.mrf.mxu0 }
 0x155   : > { %9703 = vmatpush3.msra.mxu0 %v11434_v37  ;;  %9712 = vmatpush3.msra.mxu1 %v11398_v5  ;;  %v2231_v14 = vadd.f32 %v2230_v11, %v2140_v32  ;;  %v9281_v15 = vpop.f32.mrf.mxu1  ;;  %v8455_v37 = vld [vmem:[%s12278_s1 + $0x160] sm:$0xff]  ;;  %v6705_v32 = vsel %vm162_vm0, %v8462_v1, 0 }
 0x156   : > { %9704 = vmatprep.subr.mxu0 %v11452_v53  ;;  %9713 = vmatprep.subr.mxu1 %v11408_v16  ;;  %v2318_v23 = vadd.f32 %v9281_v15, %v2237_v7  ;;  %v11664_v7 = vand.u32 4294901760, %v6705_v32 }
 0x157   : > { %9705 = vmatpush3.msra.mxu0 %v11452_v53  ;;  %9714 = vmatpush3.msra.mxu1 %v11408_v16  ;;  %v2311_v27 = vpop.f32.mrf.mxu1 }
 0x158   : > { %9706 = vmatprep.subr.mxu0 %v11471_v34  ;;  %9715 = vmatprep.subr.mxu1 %v11419_v35  ;;  %v11558_v53 = vadd.f32 %v2318_v23, %v11425_v50  ;;  %v2312_v24 = vadd.f32 %v2311_v27, %v2231_v14  ;;  %v11576_v50 = vand.u32 4294901760, %v8455_v37  ;;  %v6699_v23 = vsel %vm155_vm1, %v6691_v4, 0 }
 0x159   : > { %9707 = vmatpush3.msra.mxu0 %v11471_v34  ;;  %9708 = vmatprep.mubr.f32.mxu0 %v11458_v44  ;;  %v11582_v34 = vand.u32 4294901760, %v11550_v47  ;;  %v11596_v44 = vand.u32 4294901760, %v11567_v60  ;;  %v6702_v27 = vsel %vm155_vm1, %v6692_v10, 0  ;;  %v7238_v10 = vld [vmem:[%s10218_s5 + $0x15] sm:$0xff] }
 0x15a   : > { %9716 = vmatpush3.msra.mxu1 %v11419_v35  ;;  %9709 = vmatmul.mubr.f32.vlgmr.msra.gmra.mxu0 %v11466_v12  ;;  %v11572_v45 = vadd.f32 %v2312_v24, %v11439_v36  ;;  %v11591_v36 = vsub.f32 %v6153_v20, %v11562_v21  ;;  %v11674_v20 = vand.u32 4294901760, %v8461_v3  ;;  %v11685_v24 = vand.u32 4294901760, %v8460_v13 }
 0x15b   : > { %9717 = vmatprep.subr.mxu1 %v11443_v22  ;;  %9722 = vmatprep.subr.mxu0 %v11449_v40  ;;  %v6285_v18 = vsub.f32 %v11567_v60, %v11596_v44 }
 0x15c   : > { %9718 = vmatpush3.msra.mxu1 %v11443_v22  ;;  %9719 = vmatprep.mubr.f32.mxu1 %v5686_v8  ;;  %v9292_v43 = vpop.f32.mrf.mxu0  ;;  %v11599_v8 = vsub.f32 %v6156_v25, %v11569_v49 }
 0x15d   : > { %9723 = vmatpush3.msra.mxu0 %v11449_v40  ;;  %9720 = vmatmul.mubr.f32.vlgmr.msra.gmra.mxu1 %v5696_v28  ;;  %v11604_v40 = vsub.f32 %v8455_v37, %v11576_v50  ;;  %v6278_v28 = vsub.f32 %v11550_v47, %v11582_v34  ;;  %v6286_v41 = vand.u32 4294901760, %v6285_v18  ;;  %v11683_v37 = vsub.f32 %v6705_v32, %v11664_v7 }
 0x15e   : > { %9724 = vmatprep.subr.mxu0 %v11463_v51  ;;  %9733 = vmatprep.subr.mxu1 %v11398_v5  ;;  %v6242_v58 = vand.u32 4294901760, %v11599_v8 }
 0x15f   : > { %9725 = vmatpush3.msra.mxu0 %v11463_v51  ;;  %9734 = vmatpush3.msra.mxu1 %v11398_v5  ;;  %v9303_v12 = vpop.f32.mrf.mxu1  ;;  %v6232_v5 = vand.u32 4294901760, %v11591_v36  ;;  %v2414_v51 = vpop.f32.mrf.mxu0 }
 0x160   : > { %9726 = vmatprep.subr.mxu0 %v11478_v52  ;;  %9735 = vmatprep.subr.mxu1 %v11408_v16  ;;  %v2522_v56 = vadd.f32 %v9303_v12, %v9292_v43  ;;  %v11695_v12 = vand.u32 4294901760, %v6699_v23 }
 0x161   : > { %9727 = vmatpush3.msra.mxu0 %v11478_v52  ;;  %9736 = vmatpush3.msra.mxu1 %v11408_v16  ;;  %v2515_v62 = vpop.f32.mrf.mxu1  ;;  %v11624_v16 = vand.u32 4294901760, %v11604_v40  ;;  %v6279_v52 = vand.u32 4294901760, %v6278_v28  ;;  %v11700_v28 = vsub.f32 %v8461_v3, %v11674_v20  ;;  %v7237_v3 = vld [vmem:[%s10218_s5 + $0xd] sm:$0xff] }
 0x162   : > { %9728 = vmatprep.subr.mxu0 %v11491_v19  ;;  %9737 = vmatprep.subr.mxu1 %v11419_v35  ;;  %v2516_v29 = vadd.f32 %v2515_v62, %v2414_v51  ;;  %v11718_v62 = vsub.f32 %v8460_v13, %v11685_v24  ;;  %v8464_v13 = vld [vmem:[%s12278_s1 + $0x1a8] sm:$0xff] }
 0x163   : > { %9729 = vmatpush3.msra.mxu0 %v11491_v19  ;;  %9730 = vmatprep.mubr.f32.mxu0 %v11429_v46  ;;  %v6233_v19 = vsub.f32 %v11591_v36, %v6232_v5  ;;  %v6299_v38 = vsub.f32 %v11604_v40, %v11624_v16 }
 0x164   : > { %9738 = vmatpush3.msra.mxu1 %v11419_v35  ;;  %9731 = vmatmul.mubr.f32.vlgmr.msra.gmra.mxu0 %v11436_v59  ;;  %v6243_v35 = vsub.f32 %v11599_v8, %v6242_v58 }
 0x165   : > { %9739 = vmatprep.subr.mxu1 %v11443_v22  ;;  %9744 = vmatprep.subr.mxu0 %v11531_v9  ;;  %v6300_v48 = vand.u32 4294901760, %v6299_v38 }
 0x166   : > { %9740 = vmatpush3.msra.mxu1 %v11443_v22  ;;  %9741 = vmatprep.mubr.f32.mxu1 %v11429_v46  ;;  %v9314_v33 = vpop.f32.mrf.mxu0  ;;  %v6293_v22 = vand.u32 4294901760, %v6292_v63  ;;  %v6234_v46 = vand.u32 4294901760, %v6233_v19  ;;  %v6244_v0 = vand.u32 4294901760, %v6243_v35 }
 0x167   : > { %9745 = vmatpush3.msra.mxu0 %v11531_v9  ;;  %9742 = vmatmul.mubr.f32.vlgmr.msra.gmra.mxu1 %v11436_v59  ;;  %v2609_v31 = vadd.f32 %v9314_v33, %v2522_v56  ;;  %v11702_v56 = vand.u32 4294901760, %v6702_v27 }
 0x168   : > { %9746 = vmatprep.subr.mxu0 %v11541_v17  ;;  %9755 = vmatprep.subr.mxu1 %v6279_v52  ;;  %v2601_v42 = vpop.f32.mrf.mxu0 }
 0x169   : > { %9747 = vmatpush3.msra.mxu0 %v11541_v17  ;;  %9756 = vmatpush3.msra.mxu1 %v6279_v52  ;;  %v2602_v55 = vadd.f32 %v2601_v42, %v2516_v29  ;;  %v9325_v30 = vpop.f32.mrf.mxu1  ;;  %v11744_v29 = vand.u32 4294901760, %v11718_v62 }
 0x16a   : > { %9748 = vmatprep.subr.mxu0 %v11552_v54  ;;  %9757 = vmatprep.subr.mxu1 %v6286_v41  ;;  %v2694_v59 = vadd.f32 %v9325_v30, %v2609_v31 }
 0x16b   : > { %9749 = vmatpush3.msra.mxu0 %v11552_v54  ;;  %9758 = vmatpush3.msra.mxu1 %v6286_v41  ;;  %v2685_v39 = vpop.f32.mrf.mxu1  ;;  %v6838_v33 = vsub.f32 %v11718_v62, %v11744_v29 }
 0x16c   : > { %9750 = vmatprep.subr.mxu0 %v11576_v50  ;;  %9759 = vmatprep.subr.mxu1 %v6293_v22  ;;  %v2686_v2 = vadd.f32 %v2685_v39, %v2602_v55  ;;  %v8466_v39 = vld [vmem:[%s12278_s1 + $0x1b8] sm:$0x3f] }
 0x16d   : > { %9751 = vmatpush3.msra.mxu0 %v11576_v50  ;;  %9752 = vmatprep.mubr.f32.mxu0 %v6234_v46 }
 0x16e   : > { %9760 = vmatpush3.msra.mxu1 %v6293_v22  ;;  %9753 = vmatmul.mubr.f32.vlgmr.msra.gmra.mxu0 %v6244_v0 }
 0x16f   : > { %9761 = vmatprep.subr.mxu1 %v6300_v48  ;;  %9766 = vmatprep.subr.mxu0 %v11550_v47 }
 0x170   : > { %9762 = vmatpush3.msra.mxu1 %v6300_v48  ;;  %9763 = vmatprep.mubr.f32.mxu1 %v11562_v21  ;;  %v9336_v57 = vpop.f32.mrf.mxu0 }
 0x171   : > { %9767 = vmatpush3.msra.mxu0 %v11550_v47  ;;  %9764 = vmatmul.mubr.f32.vlgmr.msra.gmra.mxu1 %v11569_v49  ;;  %v2783_v6 = vadd.f32 %v9336_v57, %v2694_v59  ;;  %v8465_v57 = vld [vmem:[%s12278_s1 + $0x1b0] sm:$0xff] }
 0x172   : > { %9768 = vmatprep.subr.mxu0 %v11567_v60  ;;  %9777 = vmatprep.subr.mxu1 %v11531_v9  ;;  %v2776_v11 = vpop.f32.mrf.mxu0 }
 0x173   : > { %9769 = vmatpush3.msra.mxu0 %v11567_v60  ;;  %9778 = vmatpush3.msra.mxu1 %v11531_v9  ;;  %v2777_v14 = vadd.f32 %v2776_v11, %v2686_v2  ;;  %v9347_v15 = vpop.f32.mrf.mxu1  ;;  %v8459_v60 = vld [vmem:[%s12278_s1 + $0x180] sm:$0xff]  ;;  %v7251_v2 = vsel %vm162_vm0, %v8466_v39, 0 }
 0x174   : > { %9770 = vmatprep.subr.mxu0 %v11585_v61  ;;  %9779 = vmatprep.subr.mxu1 %v11541_v17  ;;  %v2864_v25 = vadd.f32 %v9347_v15, %v2783_v6  ;;  %v11797_v6 = vand.u32 4294901760, %v7251_v2 }
 0x175   : > { %9771 = vmatpush3.msra.mxu0 %v11585_v61  ;;  %9780 = vmatpush3.msra.mxu1 %v11541_v17  ;;  %v2857_v47 = vpop.f32.mrf.mxu1 }
 0x176   : > { %9772 = vmatprep.subr.mxu0 %v11604_v40  ;;  %9781 = vmatprep.subr.mxu1 %v11552_v54  ;;  %v11691_v61 = vadd.f32 %v2864_v25, %v11558_v53  ;;  %v2858_v43 = vadd.f32 %v2857_v47, %v2777_v14  ;;  %v11709_v53 = vand.u32 4294901760, %v8459_v60  ;;  %v7245_v25 = vsel %vm155_vm1, %v7237_v3, 0 }
 0x177   : > { %9773 = vmatpush3.msra.mxu0 %v11604_v40  ;;  %9774 = vmatprep.mubr.f32.mxu0 %v11591_v36  ;;  %v11715_v40 = vand.u32 4294901760, %v11683_v37  ;;  %v11729_v36 = vand.u32 4294901760, %v11700_v28  ;;  %v7248_v47 = vsel %vm155_vm1, %v7238_v10, 0  ;;  %v7784_v10 = vld [vmem:[%s10218_s5 + $0x16] sm:$0xff] }
 0x178   : > { %9782 = vmatpush3.msra.mxu1 %v11552_v54  ;;  %9775 = vmatmul.mubr.f32.vlgmr.msra.gmra.mxu0 %v11599_v8  ;;  %v11705_v51 = vadd.f32 %v2858_v43, %v11572_v45  ;;  %v11724_v45 = vsub.f32 %v6699_v23, %v11695_v12  ;;  %v11807_v23 = vand.u32 4294901760, %v8465_v57  ;;  %v11818_v43 = vand.u32 4294901760, %v8464_v13 }
 0x179   : > { %9783 = vmatprep.subr.mxu1 %v11576_v50  ;;  %9788 = vmatprep.subr.mxu0 %v11582_v34  ;;  %v6831_v19 = vsub.f32 %v11700_v28, %v11729_v36 }
 0x17a   : > { %9784 = vmatpush3.msra.mxu1 %v11576_v50  ;;  %9785 = vmatprep.mubr.f32.mxu1 %v6232_v5  ;;  %v9358_v18 = vpop.f32.mrf.mxu0  ;;  %v11732_v5 = vsub.f32 %v6702_v27, %v11702_v56 }
 0x17b   : > { %9789 = vmatpush3.msra.mxu0 %v11582_v34  ;;  %9786 = vmatmul.mubr.f32.vlgmr.msra.gmra.mxu1 %v6242_v58  ;;  %v11737_v34 = vsub.f32 %v8459_v60, %v11709_v53  ;;  %v6824_v58 = vsub.f32 %v11683_v37, %v11715_v40  ;;  %v6832_v38 = vand.u32 4294901760, %v6831_v19  ;;  %v11816_v60 = vsub.f32 %v7251_v2, %v11797_v6 }
 0x17c   : > { %9790 = vmatprep.subr.mxu0 %v11596_v44  ;;  %9799 = vmatprep.subr.mxu1 %v11531_v9  ;;  %v6788_v41 = vand.u32 4294901760, %v11732_v5 }
 0x17d   : > { %9791 = vmatpush3.msra.mxu0 %v11596_v44  ;;  %9800 = vmatpush3.msra.mxu1 %v11531_v9  ;;  %v9369_v8 = vpop.f32.mrf.mxu1  ;;  %v6778_v9 = vand.u32 4294901760, %v11724_v45  ;;  %v2960_v44 = vpop.f32.mrf.mxu0 }
 0x17e   : > { %9792 = vmatprep.subr.mxu0 %v11611_v26  ;;  %9801 = vmatprep.subr.mxu1 %v11541_v17  ;;  %v3068_v52 = vadd.f32 %v9369_v8, %v9358_v18  ;;  %v11828_v8 = vand.u32 4294901760, %v7245_v25 }
 0x17f   : > { %9793 = vmatpush3.msra.mxu0 %v11611_v26  ;;  %9802 = vmatpush3.msra.mxu1 %v11541_v17  ;;  %v3061_v63 = vpop.f32.mrf.mxu1  ;;  %v11757_v17 = vand.u32 4294901760, %v11737_v34  ;;  %v6825_v26 = vand.u32 4294901760, %v6824_v58  ;;  %v11833_v58 = vsub.f32 %v8465_v57, %v11807_v23  ;;  %v7783_v57 = vld [vmem:[%s10218_s5 + $0xe] sm:$0xff] }
 0x180   : > { %9794 = vmatprep.subr.mxu0 %v11624_v16  ;;  %9803 = vmatprep.subr.mxu1 %v11552_v54  ;;  %v3062_v35 = vadd.f32 %v3061_v63, %v2960_v44  ;;  %v11851_v63 = vsub.f32 %v8464_v13, %v11818_v43  ;;  %v8468_v13 = vld [vmem:[%s12278_s1 + $0x1c8] sm:$0xff] }
 0x181   : > { %9795 = vmatpush3.msra.mxu0 %v11624_v16  ;;  %9796 = vmatprep.mubr.f32.mxu0 %v11562_v21  ;;  %v6779_v16 = vsub.f32 %v11724_v45, %v6778_v9  ;;  %v6845_v22 = vsub.f32 %v11737_v34, %v11757_v17 }
 0x182   : > { %9804 = vmatpush3.msra.mxu1 %v11552_v54  ;;  %9797 = vmatmul.mubr.f32.vlgmr.msra.gmra.mxu0 %v11569_v49  ;;  %v6789_v54 = vsub.f32 %v11732_v5, %v6788_v41 }
 0x183   : > { %9805 = vmatprep.subr.mxu1 %v11576_v50  ;;  %9810 = vmatprep.subr.mxu0 %v11664_v7  ;;  %v6846_v59 = vand.u32 4294901760, %v6845_v22 }
 0x184   : > { %9806 = vmatpush3.msra.mxu1 %v11576_v50  ;;  %9807 = vmatprep.mubr.f32.mxu1 %v11562_v21  ;;  %v9380_v31 = vpop.f32.mrf.mxu0  ;;  %v6839_v50 = vand.u32 4294901760, %v6838_v33  ;;  %v6780_v21 = vand.u32 4294901760, %v6779_v16  ;;  %v6790_v0 = vand.u32 4294901760, %v6789_v54 }
 0x185   : > { %9811 = vmatpush3.msra.mxu0 %v11664_v7  ;;  %9808 = vmatmul.mubr.f32.vlgmr.msra.gmra.mxu1 %v11569_v49  ;;  %v3155_v42 = vadd.f32 %v9380_v31, %v3068_v52  ;;  %v11835_v52 = vand.u32 4294901760, %v7248_v47 }
 0x186   : > { %9812 = vmatprep.subr.mxu0 %v11674_v20  ;;  %9821 = vmatprep.subr.mxu1 %v6825_v26  ;;  %v3147_v46 = vpop.f32.mrf.mxu0 }
 0x187   : > { %9813 = vmatpush3.msra.mxu0 %v11674_v20  ;;  %9822 = vmatpush3.msra.mxu1 %v6825_v26  ;;  %v3148_v55 = vadd.f32 %v3147_v46, %v3062_v35  ;;  %v9391_v30 = vpop.f32.mrf.mxu1  ;;  %v11877_v35 = vand.u32 4294901760, %v11851_v63 }
 0x188   : > { %9814 = vmatprep.subr.mxu0 %v11685_v24  ;;  %9823 = vmatprep.subr.mxu1 %v6832_v38  ;;  %v3240_v49 = vadd.f32 %v9391_v30, %v3155_v42 }
 0x189   : > { %9815 = vmatpush3.msra.mxu0 %v11685_v24  ;;  %9824 = vmatpush3.msra.mxu1 %v6832_v38  ;;  %v3231_v48 = vpop.f32.mrf.mxu1  ;;  %v7384_v31 = vsub.f32 %v11851_v63, %v11877_v35 }
 0x18a   : > { %9816 = vmatprep.subr.mxu0 %v11709_v53  ;;  %9825 = vmatprep.subr.mxu1 %v6839_v50  ;;  %v3232_v1 = vadd.f32 %v3231_v48, %v3148_v55  ;;  %v8470_v48 = vld [vmem:[%s12278_s1 + $0x1d8] sm:$0x3f] }
 0x18b   : > { %9817 = vmatpush3.msra.mxu0 %v11709_v53  ;;  %9818 = vmatprep.mubr.f32.mxu0 %v6780_v21 }
 0x18c   : > { %9826 = vmatpush3.msra.mxu1 %v6839_v50  ;;  %9819 = vmatmul.mubr.f32.vlgmr.msra.gmra.mxu0 %v6790_v0 }
 0x18d   : > { %9827 = vmatprep.subr.mxu1 %v6846_v59  ;;  %9832 = vmatprep.subr.mxu0 %v11683_v37 }
 0x18e   : > { %9828 = vmatpush3.msra.mxu1 %v6846_v59  ;;  %9829 = vmatprep.mubr.f32.mxu1 %v11695_v12  ;;  %v9402_v32 = vpop.f32.mrf.mxu0 }
 0x18f   : > { %9833 = vmatpush3.msra.mxu0 %v11683_v37  ;;  %9830 = vmatmul.mubr.f32.vlgmr.msra.gmra.mxu1 %v11702_v56  ;;  %v3329_v4 = vadd.f32 %v9402_v32, %v3240_v49  ;;  %v8469_v32 = vld [vmem:[%s12278_s1 + $0x1d0] sm:$0xff] }
 0x190   : > { %9834 = vmatprep.subr.mxu0 %v11700_v28  ;;  %9843 = vmatprep.subr.mxu1 %v11664_v7  ;;  %v3322_v11 = vpop.f32.mrf.mxu0 }
 0x191   : > { %9835 = vmatpush3.msra.mxu0 %v11700_v28  ;;  %9844 = vmatpush3.msra.mxu1 %v11664_v7  ;;  %v3323_v14 = vadd.f32 %v3322_v11, %v3232_v1  ;;  %v9413_v15 = vpop.f32.mrf.mxu1  ;;  %v8463_v28 = vld [vmem:[%s12278_s1 + $0x1a0] sm:$0xff]  ;;  %v7797_v1 = vsel %vm162_vm0, %v8470_v48, 0 }
 0x192   : > { %9836 = vmatprep.subr.mxu0 %v11718_v62  ;;  %9845 = vmatprep.subr.mxu1 %v11674_v20  ;;  %v3410_v27 = vadd.f32 %v9413_v15, %v3329_v4  ;;  %v11930_v4 = vand.u32 4294901760, %v7797_v1 }
 0x193   : > { %9837 = vmatpush3.msra.mxu0 %v11718_v62  ;;  %9846 = vmatpush3.msra.mxu1 %v11674_v20  ;;  %v3403_v37 = vpop.f32.mrf.mxu1 }
 0x194   : > { %9838 = vmatprep.subr.mxu0 %v11737_v34  ;;  %9847 = vmatprep.subr.mxu1 %v11685_v24  ;;  %v11824_v62 = vadd.f32 %v3410_v27, %v11691_v61  ;;  %v3404_v18 = vadd.f32 %v3403_v37, %v3323_v14  ;;  %v11842_v61 = vand.u32 4294901760, %v8463_v28  ;;  %v7791_v27 = vsel %vm155_vm1, %v7783_v57, 0 }
 0x195   : > { %9839 = vmatpush3.msra.mxu0 %v11737_v34  ;;  %9840 = vmatprep.mubr.f32.mxu0 %v11724_v45  ;;  %v11848_v34 = vand.u32 4294901760, %v11816_v60  ;;  %v11862_v45 = vand.u32 4294901760, %v11833_v58  ;;  %v7794_v37 = vsel %vm155_vm1, %v7784_v10, 0 }
 0x196   : > { %9848 = vmatpush3.msra.mxu1 %v11685_v24  ;;  %9841 = vmatmul.mubr.f32.vlgmr.msra.gmra.mxu0 %v11732_v5  ;;  %v11838_v44 = vadd.f32 %v3404_v18, %v11705_v51  ;;  %v11857_v51 = vsub.f32 %v7245_v25, %v11828_v8  ;;  %v11940_v25 = vand.u32 4294901760, %v8469_v32  ;;  %v11951_v18 = vand.u32 4294901760, %v8468_v13 }
 0x197   : > { %9849 = vmatprep.subr.mxu1 %v11709_v53  ;;  %9854 = vmatprep.subr.mxu0 %v11715_v40  ;;  %v7377_v16 = vsub.f32 %v11833_v58, %v11862_v45 }
 0x198   : > { %9850 = vmatpush3.msra.mxu1 %v11709_v53  ;;  %9851 = vmatprep.mubr.f32.mxu1 %v6778_v9  ;;  %v9424_v19 = vpop.f32.mrf.mxu0  ;;  %v11865_v9 = vsub.f32 %v7248_v47, %v11835_v52 }
 0x199   : > { %9855 = vmatpush3.msra.mxu0 %v11715_v40  ;;  %9852 = vmatmul.mubr.f32.vlgmr.msra.gmra.mxu1 %v6788_v41  ;;  %v11870_v40 = vsub.f32 %v8463_v28, %v11842_v61  ;;  %v7370_v41 = vsub.f32 %v11816_v60, %v11848_v34  ;;  %v7378_v22 = vand.u32 4294901760, %v7377_v16  ;;  %v11949_v28 = vsub.f32 %v7797_v1, %v11930_v4 }
 0x19a   : > { %9856 = vmatprep.subr.mxu0 %v11729_v36  ;;  %9865 = vmatprep.subr.mxu1 %v11664_v7  ;;  %v7334_v38 = vand.u32 4294901760, %v11865_v9 }
 0x19b   : > { %9857 = vmatpush3.msra.mxu0 %v11729_v36  ;;  %9866 = vmatpush3.msra.mxu1 %v11664_v7  ;;  %v9435_v5 = vpop.f32.mrf.mxu1  ;;  %v7324_v7 = vand.u32 4294901760, %v11857_v51  ;;  %v3506_v36 = vpop.f32.mrf.mxu0 }
 0x19c   : > { %9858 = vmatprep.subr.mxu0 %v11744_v29  ;;  %9867 = vmatprep.subr.mxu1 %v11674_v20  ;;  %v3614_v26 = vadd.f32 %v9435_v5, %v9424_v19  ;;  %v11961_v5 = vand.u32 4294901760, %v7791_v27 }
 0x19d   : > { %9859 = vmatpush3.msra.mxu0 %v11744_v29  ;;  %9868 = vmatpush3.msra.mxu1 %v11674_v20  ;;  %v3607_v33 = vpop.f32.mrf.mxu1  ;;  %v11890_v20 = vand.u32 4294901760, %v11870_v40  ;;  %v7371_v29 = vand.u32 4294901760, %v7370_v41  ;;  %v11966_v41 = vsub.f32 %v8469_v32, %v11940_v25 }
 0x19e   : > { %9860 = vmatprep.subr.mxu0 %v11757_v17  ;;  %9869 = vmatprep.subr.mxu1 %v11685_v24  ;;  %v3608_v54 = vadd.f32 %v3607_v33, %v3506_v36  ;;  %v11984_v33 = vsub.f32 %v8468_v13, %v11951_v18 }
 0x19f   : > { %9861 = vmatpush3.msra.mxu0 %v11757_v17  ;;  %9862 = vmatprep.mubr.f32.mxu0 %v11695_v12  ;;  %v7325_v17 = vsub.f32 %v11857_v51, %v7324_v7  ;;  %v7391_v50 = vsub.f32 %v11870_v40, %v11890_v20 }
 0x1a0   : > { %9870 = vmatpush3.msra.mxu1 %v11685_v24  ;;  %9863 = vmatmul.mubr.f32.vlgmr.msra.gmra.mxu0 %v11702_v56  ;;  %v7335_v24 = vsub.f32 %v11865_v9, %v7334_v38 }
 0x1a1   : > { %9871 = vmatprep.subr.mxu1 %v11709_v53  ;;  %9876 = vmatprep.subr.mxu0 %v11797_v6  ;;  %v7392_v49 = vand.u32 4294901760, %v7391_v50 }
 0x1a2   : > { %9872 = vmatpush3.msra.mxu1 %v11709_v53  ;;  %9873 = vmatprep.mubr.f32.mxu1 %v11695_v12  ;;  %v9446_v42 = vpop.f32.mrf.mxu0  ;;  %v7385_v53 = vand.u32 4294901760, %v7384_v31  ;;  %v7326_v12 = vand.u32 4294901760, %v7325_v17  ;;  %v7336_v0 = vand.u32 4294901760, %v7335_v24 }
 0x1a3   : > { %9877 = vmatpush3.msra.mxu0 %v11797_v6  ;;  %9874 = vmatmul.mubr.f32.vlgmr.msra.gmra.mxu1 %v11702_v56  ;;  %v3701_v46 = vadd.f32 %v9446_v42, %v3614_v26  ;;  %v11968_v26 = vand.u32 4294901760, %v7794_v37 }
 0x1a4   : > { %9878 = vmatprep.subr.mxu0 %v11807_v23  ;;  %9887 = vmatprep.subr.mxu1 %v7371_v29  ;;  %v3693_v21 = vpop.f32.mrf.mxu0 }
 0x1a5   : > { %9879 = vmatpush3.msra.mxu0 %v11807_v23  ;;  %9888 = vmatpush3.msra.mxu1 %v7371_v29  ;;  %v3694_v55 = vadd.f32 %v3693_v21, %v3608_v54  ;;  %v9457_v30 = vpop.f32.mrf.mxu1  ;;  %v12010_v54 = vand.u32 4294901760, %v11984_v33 }
 0x1a6   : > { %9880 = vmatprep.subr.mxu0 %v11818_v43  ;;  %9889 = vmatprep.subr.mxu1 %v7378_v22  ;;  %v3786_v56 = vadd.f32 %v9457_v30, %v3701_v46 }
 0x1a7   : > { %9881 = vmatpush3.msra.mxu0 %v11818_v43  ;;  %9890 = vmatpush3.msra.mxu1 %v7378_v22  ;;  %v3777_v59 = vpop.f32.mrf.mxu1  ;;  %v7930_v42 = vsub.f32 %v11984_v33, %v12010_v54 }
 0x1a8   : > { %9882 = vmatprep.subr.mxu0 %v11842_v61  ;;  %9891 = vmatprep.subr.mxu1 %v7385_v53  ;;  %v3778_v39 = vadd.f32 %v3777_v59, %v3694_v55 }
 0x1a9   : > { %9883 = vmatpush3.msra.mxu0 %v11842_v61  ;;  %9884 = vmatprep.mubr.f32.mxu0 %v7326_v12 }
 0x1aa   : > { %9892 = vmatpush3.msra.mxu1 %v7385_v53  ;;  %9885 = vmatmul.mubr.f32.vlgmr.msra.gmra.mxu0 %v7336_v0 }
 0x1ab   : > { %9893 = vmatprep.subr.mxu1 %v7392_v49  ;;  %9898 = vmatprep.subr.mxu0 %v11816_v60 }
 0x1ac   : > { %9894 = vmatpush3.msra.mxu1 %v7392_v49  ;;  %9895 = vmatprep.mubr.f32.mxu1 %v11828_v8  ;;  %v9468_v2 = vpop.f32.mrf.mxu0 }
 0x1ad   : > { %9899 = vmatpush3.msra.mxu0 %v11816_v60  ;;  %9896 = vmatmul.mubr.f32.vlgmr.msra.gmra.mxu1 %v11835_v52  ;;  %v3875_v3 = vadd.f32 %v9468_v2, %v3786_v56 }
 0x1ae   : > { %9900 = vmatprep.subr.mxu0 %v11833_v58  ;;  %9909 = vmatprep.subr.mxu1 %v11797_v6  ;;  %v3868_v11 = vpop.f32.mrf.mxu0 }
 0x1af   : > { %9901 = vmatpush3.msra.mxu0 %v11833_v58  ;;  %9910 = vmatpush3.msra.mxu1 %v11797_v6  ;;  %v3869_v14 = vadd.f32 %v3868_v11, %v3778_v39  ;;  %v9479_v15 = vpop.f32.mrf.mxu1  ;;  %v8467_v58 = vld [vmem:[%s12278_s1 + $0x1c0] sm:$0xff] }
 0x1b0   : > { %9902 = vmatprep.subr.mxu0 %v11851_v63  ;;  %9911 = vmatprep.subr.mxu1 %v11807_v23  ;;  %v3956_v47 = vadd.f32 %v9479_v15, %v3875_v3 }
 0x1b1   : > { %9903 = vmatpush3.msra.mxu0 %v11851_v63  ;;  %9912 = vmatpush3.msra.mxu1 %v11807_v23  ;;  %v3949_v60 = vpop.f32.mrf.mxu1 }
 0x1b2   : > { %9904 = vmatprep.subr.mxu0 %v11870_v40  ;;  %9913 = vmatprep.subr.mxu1 %v11818_v43  ;;  %v11957_v63 = vadd.f32 %v3956_v47, %v11824_v62  ;;  %v3950_v19 = vadd.f32 %v3949_v60, %v3869_v14  ;;  %v11975_v62 = vand.u32 4294901760, %v8467_v58 }
 0x1b3   : > { %9905 = vmatpush3.msra.mxu0 %v11870_v40  ;;  %9906 = vmatprep.mubr.f32.mxu0 %v11857_v51  ;;  %v11981_v40 = vand.u32 4294901760, %v11949_v28  ;;  %v11995_v51 = vand.u32 4294901760, %v11966_v41 }
 0x1b4   : > { %9914 = vmatpush3.msra.mxu1 %v11818_v43  ;;  %9907 = vmatmul.mubr.f32.vlgmr.msra.gmra.mxu0 %v11865_v9  ;;  %v11971_v36 = vadd.f32 %v3950_v19, %v11838_v44  ;;  %v11990_v44 = vsub.f32 %v7791_v27, %v11961_v5 }
 0x1b5   : > { %9915 = vmatprep.subr.mxu1 %v11842_v61  ;;  %9920 = vmatprep.subr.mxu0 %v11848_v34  ;;  %v7923_v17 = vsub.f32 %v11966_v41, %v11995_v51 }
 0x1b6   : > { %9916 = vmatpush3.msra.mxu1 %v11842_v61  ;;  %9917 = vmatprep.mubr.f32.mxu1 %v7324_v7  ;;  %v9490_v16 = vpop.f32.mrf.mxu0  ;;  %v11998_v7 = vsub.f32 %v7794_v37, %v11968_v26 }
 0x1b7   : > { %9921 = vmatpush3.msra.mxu0 %v11848_v34  ;;  %9918 = vmatmul.mubr.f32.vlgmr.msra.gmra.mxu1 %v7334_v38  ;;  %v12003_v34 = vsub.f32 %v8467_v58, %v11975_v62  ;;  %v7916_v38 = vsub.f32 %v11949_v28, %v11981_v40  ;;  %v7924_v50 = vand.u32 4294901760, %v7923_v17 }
 0x1b8   : > { %9922 = vmatprep.subr.mxu0 %v11862_v45  ;;  %9931 = vmatprep.subr.mxu1 %v11797_v6  ;;  %v7880_v22 = vand.u32 4294901760, %v11998_v7 }
 0x1b9   : > { %9923 = vmatpush3.msra.mxu0 %v11862_v45  ;;  %9932 = vmatpush3.msra.mxu1 %v11797_v6  ;;  %v9501_v9 = vpop.f32.mrf.mxu1  ;;  %v7870_v6 = vand.u32 4294901760, %v11990_v44  ;;  %v4052_v45 = vpop.f32.mrf.mxu0 }
 0x1ba   : > { %9924 = vmatprep.subr.mxu0 %v11877_v35  ;;  %9933 = vmatprep.subr.mxu1 %v11807_v23  ;;  %v4160_v29 = vadd.f32 %v9501_v9, %v9490_v16 }
 0x1bb   : > { %9925 = vmatpush3.msra.mxu0 %v11877_v35  ;;  %9934 = vmatpush3.msra.mxu1 %v11807_v23  ;;  %v4153_v31 = vpop.f32.mrf.mxu1  ;;  %v12023_v23 = vand.u32 4294901760, %v12003_v34  ;;  %v7917_v35 = vand.u32 4294901760, %v7916_v38 }
 0x1bc   : > { %9926 = vmatprep.subr.mxu0 %v11890_v20  ;;  %9935 = vmatprep.subr.mxu1 %v11818_v43  ;;  %v4154_v24 = vadd.f32 %v4153_v31, %v4052_v45 }
 0x1bd   : > { %9927 = vmatpush3.msra.mxu0 %v11890_v20  ;;  %9928 = vmatprep.mubr.f32.mxu0 %v11828_v8  ;;  %v7871_v20 = vsub.f32 %v11990_v44, %v7870_v6  ;;  %v7937_v53 = vsub.f32 %v12003_v34, %v12023_v23 }
 0x1be   : > { %9936 = vmatpush3.msra.mxu1 %v11818_v43  ;;  %9929 = vmatmul.mubr.f32.vlgmr.msra.gmra.mxu0 %v11835_v52  ;;  %v7881_v43 = vsub.f32 %v11998_v7, %v7880_v22 }
 0x1bf   : > { %9937 = vmatprep.subr.mxu1 %v11842_v61  ;;  %9942 = vmatprep.subr.mxu0 %v11930_v4  ;;  %v7938_v56 = vand.u32 4294901760, %v7937_v53 }
 0x1c0   : > { %9938 = vmatpush3.msra.mxu1 %v11842_v61  ;;  %9939 = vmatprep.mubr.f32.mxu1 %v11828_v8  ;;  %v9512_v46 = vpop.f32.mrf.mxu0  ;;  %v7931_v61 = vand.u32 4294901760, %v7930_v42  ;;  %v7872_v8 = vand.u32 4294901760, %v7871_v20  ;;  %v7882_v0 = vand.u32 4294901760, %v7881_v43 }
 0x1c1   : > { %9943 = vmatpush3.msra.mxu0 %v11930_v4  ;;  %9940 = vmatmul.mubr.f32.vlgmr.msra.gmra.mxu1 %v11835_v52  ;;  %v4247_v21 = vadd.f32 %v9512_v46, %v4160_v29 }
 0x1c2   : > { %9944 = vmatprep.subr.mxu0 %v11940_v25  ;;  %9953 = vmatprep.subr.mxu1 %v7917_v35  ;;  %v4239_v12 = vpop.f32.mrf.mxu0 }
 0x1c3   : > { %9945 = vmatpush3.msra.mxu0 %v11940_v25  ;;  %9954 = vmatpush3.msra.mxu1 %v7917_v35  ;;  %v4240_v55 = vadd.f32 %v4239_v12, %v4154_v24  ;;  %v9523_v30 = vpop.f32.mrf.mxu1 }
 0x1c4   : > { %9946 = vmatprep.subr.mxu0 %v11951_v18  ;;  %9955 = vmatprep.subr.mxu1 %v7924_v50  ;;  %v4332_v52 = vadd.f32 %v9523_v30, %v4247_v21 }
 0x1c5   : > { %9947 = vmatpush3.msra.mxu0 %v11951_v18  ;;  %9956 = vmatpush3.msra.mxu1 %v7924_v50  ;;  %v4323_v49 = vpop.f32.mrf.mxu1 }
 0x1c6   : > { %9948 = vmatprep.subr.mxu0 %v11975_v62  ;;  %9957 = vmatprep.subr.mxu1 %v7931_v61  ;;  %v4324_v59 = vadd.f32 %v4323_v49, %v4240_v55 }
 0x1c7   : > { %9949 = vmatpush3.msra.mxu0 %v11975_v62  ;;  %9950 = vmatprep.mubr.f32.mxu0 %v7872_v8 }
 0x1c8   : > { %9958 = vmatpush3.msra.mxu1 %v7931_v61  ;;  %9951 = vmatmul.mubr.f32.vlgmr.msra.gmra.mxu0 %v7882_v0 }
 0x1c9   : > { %9959 = vmatprep.subr.mxu1 %v7938_v56  ;;  %9964 = vmatprep.subr.mxu0 %v11949_v28 }
 0x1ca   : > { %9960 = vmatpush3.msra.mxu1 %v7938_v56  ;;  %9961 = vmatprep.mubr.f32.mxu1 %v11961_v5  ;;  %v9534_v48 = vpop.f32.mrf.mxu0 }
 0x1cb   : > { %9965 = vmatpush3.msra.mxu0 %v11949_v28  ;;  %9962 = vmatmul.mubr.f32.vlgmr.msra.gmra.mxu1 %v11968_v26  ;;  %v4421_v39 = vadd.f32 %v9534_v48, %v4332_v52 }
 0x1cc   : > { %9966 = vmatprep.subr.mxu0 %v11966_v41  ;;  %9975 = vmatprep.subr.mxu1 %v11930_v4  ;;  %v4414_v1 = vpop.f32.mrf.mxu0 }
 0x1cd   : > { %9967 = vmatpush3.msra.mxu0 %v11966_v41  ;;  %9976 = vmatpush3.msra.mxu1 %v11930_v4  ;;  %v4415_v2 = vadd.f32 %v4414_v1, %v4324_v59  ;;  %v9545_v32 = vpop.f32.mrf.mxu1 }
 0x1ce   : > { %9968 = vmatprep.subr.mxu0 %v11984_v33  ;;  %9977 = vmatprep.subr.mxu1 %v11940_v25  ;;  %v4502_v57 = vadd.f32 %v9545_v32, %v4421_v39 }
 0x1cf   : > { %9969 = vmatpush3.msra.mxu0 %v11984_v33  ;;  %9978 = vmatpush3.msra.mxu1 %v11940_v25  ;;  %v4495_v3 = vpop.f32.mrf.mxu1 }
 0x1d0   : > { %9970 = vmatprep.subr.mxu0 %v12003_v34  ;;  %9979 = vmatprep.subr.mxu1 %v11951_v18  ;;  %v12064_v10 = vadd.f32 %v4502_v57, %v11957_v63  ;;  %v4496_v11 = vadd.f32 %v4495_v3, %v4415_v2 }
 0x1d1   : > { %9971 = vmatpush3.msra.mxu0 %v12003_v34  ;;  %9972 = vmatprep.mubr.f32.mxu0 %v11990_v44 }
 0x1d2   : > { %9980 = vmatpush3.msra.mxu1 %v11951_v18  ;;  %9973 = vmatmul.mubr.f32.vlgmr.msra.gmra.mxu0 %v11998_v7  ;;  %v12071_v13 = vadd.f32 %v4496_v11, %v11971_v36 }
 0x1d3   : > { %9981 = vmatprep.subr.mxu1 %v11975_v62  ;;  %9986 = vmatprep.subr.mxu0 %v11981_v40 }
 0x1d4   : > { %12282 = vst [vmem:[#allocation5_spill] sm:$0xff] %v12071_v13  ;;  %9982 = vmatpush3.msra.mxu1 %v11975_v62  ;;  %9983 = vmatprep.mubr.f32.mxu1 %v7870_v6 }
 0x1d5   : > { %9987 = vmatpush3.msra.mxu0 %v11981_v40  ;;  %9984 = vmatmul.mubr.f32.vlgmr.msra.gmra.mxu1 %v7880_v22 }
 0x1d6   : > { %9988 = vmatprep.subr.mxu0 %v11995_v51  ;;  %9997 = vmatprep.subr.mxu1 %v11930_v4 }
 0x1d7   : > { %9989 = vmatpush3.msra.mxu0 %v11995_v51  ;;  %9998 = vmatpush3.msra.mxu1 %v11930_v4  ;;  %v12099_v4 = vpop.f32.mrf.mxu0  ;;  %v12103_v15 = vpop.f32.mrf.mxu1 }
 0x1d8   : > { %9990 = vmatprep.subr.mxu0 %v12010_v54  ;;  %9999 = vmatprep.subr.mxu1 %v11940_v25 }
 0x1d9   : > { %9991 = vmatpush3.msra.mxu0 %v12010_v54  ;;  %10000 = vmatpush3.msra.mxu1 %v11940_v25  ;;  %v12101_v14 = vpop.f32.mrf.mxu0  ;;  %v4699_v27 = vpop.f32.mrf.mxu1 }
 0x1da   : > { %9992 = vmatprep.subr.mxu0 %v12023_v23  ;;  %10001 = vmatprep.subr.mxu1 %v11951_v18 }
 0x1db   : > { %9993 = vmatpush3.msra.mxu0 %v12023_v23  ;;  %9994 = vmatprep.mubr.f32.mxu0 %v11961_v5 }
 0x1dc   : > { %10002 = vmatpush3.msra.mxu1 %v11951_v18  ;;  %9995 = vmatmul.mubr.f32.vlgmr.msra.gmra.mxu0 %v11968_v26 }
 0x1dd   : > { %10003 = vmatprep.subr.mxu1 %v11975_v62  ;;  %10005 = vmatprep.mubr.f32.mxu1 %v11961_v5 }
 0x1de   : > { %10004 = vmatpush3.msra.mxu1 %v11975_v62  ;;  %v12105_v25 = vpop.f32.mrf.mxu0 }
 0x1df   : > { %10006 = vmatmul.mubr.f32.vlgmr.msra.gmra.mxu1 %v11968_v26 }
 0x1e0   : > { %v12107_v47 = vpop.f32.mrf.mxu0 }
 0x1e1   : > { %v12109_v37 = vpop.f32.mrf.mxu1 }
 0x1e3   : > { %v12113_v28 = vpop.f32.mrf.mxu1 }
 0x1e8   : > { %v12111_v60 = vpop.f32.mrf.mxu0 }
 0x1ea   : > { %v12115_v18 = vpop.f32.mrf.mxu0 }
 0x1eb   : > { %v12117_v58 = vpop.f32.mrf.mxu1 }
 0x1ed   : > { %v12119_v19 = vpop.f32.mrf.mxu1 }
 0x1f2   : > { %v9622_v63 = vpop.f32.mrf.mxu0 }
 0x1f4   : > { %v5144_v5 = vpop.f32.mrf.mxu0 }
 0x1f5   : > { %v9633_v41 = vpop.f32.mrf.mxu1 }
 0x1f7   : > { %v5245_v36 = vpop.f32.mrf.mxu1 }
 0x1fc   : > { %v9644_v26 = vpop.f32.mrf.mxu0 }
 0x1fe   : > { %v12121_v62 = vpop.f32.mrf.mxu0 }
 0x1ff   : > { %v12123_v40 = vpop.f32.mrf.mxu1 }
 0x201   : > { %v12127_v44 = vpop.f32.mrf.mxu1 }
 0x206   : > { %v12125_v33 = vpop.f32.mrf.mxu0 }
 0x208   : > { %v12129_v16 = vpop.f32.mrf.mxu0 }
 0x209   : > { %v12131_v51 = vpop.f32.mrf.mxu1 }
 0x20b   : > { %v12133_v34 = vpop.f32.mrf.mxu1 }
 0x20c   : > { %12283 = vst [vmem:[#allocation6_spill] sm:$0xff] %v12133_v34 }
 0x210   : > { %v9688_v7 = vpop.f32.mrf.mxu0 }
 0x212   : > { %v5690_v9 = vpop.f32.mrf.mxu0 }
 0x213   : > { %v9699_v38 = vpop.f32.mrf.mxu1 }
 0x215   : > { %v5791_v29 = vpop.f32.mrf.mxu1 }
 0x21a   : > { %v9710_v54 = vpop.f32.mrf.mxu0 }
 0x21c   : > { %v5877_v6 = vpop.f32.mrf.mxu0 }
 0x21d   : > { %v12135_v45 = vpop.f32.mrf.mxu1 }
 0x21f   : > { %v12139_v17 = vpop.f32.mrf.mxu1 }
 0x224   : > { %v12137_v31 = vpop.f32.mrf.mxu0 }
 0x226   : > { %v12141_v22 = vpop.f32.mrf.mxu0 }
 0x227   : > { %12284 = vst [vmem:[#allocation7_spill] sm:$0xff] %v12141_v22  ;;  %v12143_v24 = vpop.f32.mrf.mxu1  ;;  %v5798_v22 = vadd.f32 %v9699_v38, %v9688_v7 }
 0x228   : > { %12285 = vst [vmem:[#allocation8_spill] sm:$0xff] %v12143_v24  ;;  %v4700_v24 = vadd.f32 %v4699_v27, %v12101_v14 }
 0x229   : > { %v12145_v35 = vpop.f32.mrf.mxu1 }
 0x22a   : > { %12286 = vst [vmem:[#allocation9_spill] sm:$0xff] %v12145_v35 }
 0x22e   : > { %v9754_v23 = vpop.f32.mrf.mxu0 }
 0x230   : > { %v6236_v42 = vpop.f32.mrf.mxu0 }
 0x231   : > { %v9765_v20 = vpop.f32.mrf.mxu1 }
 0x233   : > { %v6337_v43 = vpop.f32.mrf.mxu1 }
 0x238   : > { %v9776_v50 = vpop.f32.mrf.mxu0 }
 0x23a   : > { %v6423_v46 = vpop.f32.mrf.mxu0 }
 0x23b   : > { %v12147_v53 = vpop.f32.mrf.mxu1 }
 0x23d   : > { %v12151_v61 = vpop.f32.mrf.mxu1 }
 0x23e   : > { %12288 = vst [vmem:[#allocation11_spill] sm:$0xff] %v12151_v61 }
 0x242   : > { %v12149_v21 = vpop.f32.mrf.mxu0 }
 0x243   : > { %12287 = vst [vmem:[#allocation10_spill] sm:$0xff] %v12149_v21  ;;  %v5246_v21 = vadd.f32 %v5245_v36, %v5144_v5 }
 0x244   : > { %v12153_v12 = vpop.f32.mrf.mxu0 }
 0x245   : > { %12289 = vst [vmem:[#allocation12_spill] sm:$0xff] %v12153_v12  ;;  %v12155_v8 = vpop.f32.mrf.mxu1  ;;  %v4706_v12 = vadd.f32 %v12103_v15, %v12099_v4  ;;  %v5332_v27 = vadd.f32 %v12121_v62, %v5246_v21 }
 0x246   : > { %12290 = vst [vmem:[#allocation13_spill] sm:$0xff] %v12155_v8 }
 0x247   : > { %v12157_v30 = vpop.f32.mrf.mxu1 }
 0x248   : > { %12291 = vst [vmem:[#allocation14_spill] sm:$0xff] %v12157_v30 }
 0x24c   : > { %v9820_v55 = vpop.f32.mrf.mxu0 }
 0x24e   : > { %v6782_v0 = vpop.f32.mrf.mxu0 }
 0x24f   : > { %v9831_v52 = vpop.f32.mrf.mxu1 }
 0x251   : > { %v6883_v49 = vpop.f32.mrf.mxu1 }
 0x256   : > { %v9842_v56 = vpop.f32.mrf.mxu0 }
 0x258   : > { %v6969_v59 = vpop.f32.mrf.mxu0 }
 0x259   : > { %v12159_v48 = vpop.f32.mrf.mxu1 }
 0x25a   : > { %12292 = vst [vmem:[#allocation15_spill] sm:$0xff] %v12159_v48 }
 0x25b   : > { %v12163_v1 = vpop.f32.mrf.mxu1 }
 0x25c   : > { %12294 = vst [vmem:[#allocation17_spill] sm:$0xff] %v12163_v1  ;;  %v4793_v1 = vadd.f32 %v12105_v25, %v4706_v12 }
 0x260   : > { %v12161_v39 = vpop.f32.mrf.mxu0 }
 0x261   : > { %12293 = vst [vmem:[#allocation16_spill] sm:$0xff] %v12161_v39 }
 0x262   : > { %v12165_v2 = vpop.f32.mrf.mxu0 }
 0x263   : > { %12295 = vst [vmem:[#allocation18_spill] sm:$0xff] %v12165_v2  ;;  %v12167_v32 = vpop.f32.mrf.mxu1  ;;  %v4786_v2 = vadd.f32 %v12107_v47, %v4700_v24  ;;  %v5792_v47 = vadd.f32 %v5791_v29, %v5690_v9  ;;  %v5885_v24 = vadd.f32 %v9710_v54, %v5798_v22  ;;  %v6884_v29 = vadd.f32 %v6883_v49, %v6782_v0  ;;  %v12300_v0 = vld [vmem:[#allocation10_spill] sm:$0xff] }
 0x264   : > { %12296 = vst [vmem:[#allocation19_spill] sm:$0xff] %v12167_v32  ;;  %v5252_v32 = vadd.f32 %v9633_v41, %v9622_v63  ;;  %v6344_v63 = vadd.f32 %v9765_v20, %v9754_v23 }
 0x265   : > { %v12169_v3 = vpop.f32.mrf.mxu1  ;;  %v4870_v4 = vadd.f32 %v12113_v28, %v4786_v2  ;;  %v5878_v5 = vadd.f32 %v5877_v6, %v5792_v47  ;;  %v6890_v28 = vadd.f32 %v9831_v52, %v9820_v55  ;;  %v5970_v9 = vadd.f32 %v12135_v45, %v5885_v24  ;;  %v12301_v52 = vld [vmem:[#allocation15_spill] sm:$0xff]  ;;  %v12305_v2 = vld [vmem:[#allocation12_spill] sm:$0xff] }
 0x266   : > { %12297 = vst [vmem:[#allocation20_spill] sm:$0xff] %v12169_v3  ;;  %v4878_v3 = vadd.f32 %v12109_v37, %v4793_v1  ;;  %v5339_v61 = vadd.f32 %v9644_v26, %v5252_v32  ;;  %v6338_v26 = vadd.f32 %v6337_v43, %v6236_v42  ;;  %v6431_v36 = vadd.f32 %v9776_v50, %v6344_v63  ;;  %v12306_v32 = vld [vmem:[#allocation17_spill] sm:$0xff] }
 0x267   : > { %v4961_v12 = vadd.f32 %v12115_v18, %v4870_v4  ;;  %v6977_v22 = vadd.f32 %v9842_v56, %v6890_v28  ;;  %v5962_v20 = vadd.f32 %v12139_v17, %v5878_v5  ;;  %v6970_v50 = vadd.f32 %v6969_v59, %v6884_v29  ;;  %v12304_v59 = vld [vmem:[#allocation8_spill] sm:$0xff] }
 0x268   : > { %v4967_v25 = vadd.f32 %v12111_v60, %v4878_v3  ;;  %v5424_v37 = vadd.f32 %v12123_v40, %v5339_v61  ;;  %v5416_v60 = vadd.f32 %v12127_v44, %v5332_v27  ;;  %v6424_v54 = vadd.f32 %v6423_v46, %v6338_v26  ;;  %v12298_v61 = vld [vmem:[#allocation7_spill] sm:$0xff]  ;;  %v12307_v3 = vld [vmem:[#allocation16_spill] sm:$0xff] }
 0x269   : > { %v5042_v6 = vadd.f32 %v12119_v19, %v4961_v12  ;;  %v6516_v44 = vadd.f32 %v12147_v53, %v6431_v36  ;;  %v6053_v55 = vadd.f32 %v12298_v61, %v5962_v20  ;;  %v7062_v17 = vadd.f32 %v12301_v52, %v6977_v22  ;;  %v12302_v53 = vld [vmem:[#allocation5_spill] sm:$0xff] }
 0x26a   : > { %v9886_v57 = vpop.f32.mrf.mxu0  ;;  %v5048_v38 = vadd.f32 %v12117_v58, %v4967_v25  ;;  %v5513_v62 = vadd.f32 %v12125_v33, %v5424_v37  ;;  %v5507_v42 = vadd.f32 %v12129_v16, %v5416_v60  ;;  %v6059_v58 = vadd.f32 %v12137_v31, %v5970_v9  ;;  %v12309_v37 = vld [vmem:[#allocation13_spill] sm:$0xff]  ;;  %v12310_v26 = vld [vmem:[#allocation18_spill] sm:$0xff] }
 0x26b   : > { %v6605_v16 = vadd.f32 %v12300_v0, %v6516_v44  ;;  %v5051_v49 = vadd.f32 %v5042_v6, %v12302_v53 }
 0x26c   : > { %v7328_v11 = vpop.f32.mrf.mxu0  ;;  %v5052_v46 = vadd.f32 %v5048_v38, %v12064_v10  ;;  %v5594_v21 = vadd.f32 %v12131_v51, %v5513_v62  ;;  %v6140_v1 = vadd.f32 %v12304_v59, %v6059_v58  ;;  %v12311_v62 = vld [vmem:[#allocation14_spill] sm:$0xff] }
 0x26d   : > { %v9897_v30 = vpop.f32.mrf.mxu1  ;;  %v6686_v5 = vadd.f32 %v12309_v37, %v6605_v16 }
 0x26e   : > { %v7436_v18 = vadd.f32 %v9897_v30, %v9886_v57  ;;  %v12299_v30 = vld [vmem:[#allocation11_spill] sm:$0xff]  ;;  %v7054_v57 = vadd.f32 %v12306_v32, %v6970_v50  ;;  %v5598_v47 = vadd.f32 %v5594_v21, %v5052_v46 }
 0x26f   : > { %v7429_v35 = vpop.f32.mrf.mxu1  ;;  %v6508_v19 = vadd.f32 %v12299_v30, %v6424_v54  ;;  %v12312_v54 = vld [vmem:[#allocation19_spill] sm:$0xff] }
 0x270   : > { %v7430_v33 = vadd.f32 %v7429_v35, %v7328_v11  ;;  %v12303_v35 = vld [vmem:[#allocation6_spill] sm:$0xff]  ;;  %v7151_v11 = vadd.f32 %v12307_v3, %v7062_v17 }
 0x271   : > { %v6599_v51 = vadd.f32 %v12305_v2, %v6508_v19 }
 0x272   : > { %v7232_v29 = vadd.f32 %v12312_v54, %v7151_v11 }
 0x273   : > { %v6680_v9 = vadd.f32 %v12311_v62, %v6599_v51 }
 0x274   : > { %v9908_v8 = vpop.f32.mrf.mxu0 }
 0x275   : > { %v7523_v43 = vadd.f32 %v9908_v8, %v7436_v18  ;;  %v5588_v8 = vadd.f32 %v12303_v35, %v5507_v42  ;;  %v12313_v42 = vld [vmem:[#allocation20_spill] sm:$0xff] }
 0x276   : > { %v7515_v34 = vpop.f32.mrf.mxu0 }
 0x277   : > { %v9919_v39 = vpop.f32.mrf.mxu1  ;;  %v7516_v56 = vadd.f32 %v7515_v34, %v7430_v33  ;;  %v12308_v34 = vld [vmem:[#allocation9_spill] sm:$0xff]  ;;  %v5597_v38 = vadd.f32 %v5588_v8, %v5051_v49 }
 0x278   : > { %v7608_v4 = vadd.f32 %v9919_v39, %v7523_v43  ;;  %v6134_v24 = vadd.f32 %v12308_v34, %v6053_v55  ;;  %v6144_v39 = vadd.f32 %v6140_v1, %v5598_v47 }
 0x279   : > { %v12178_v48 = vpop.f32.mrf.mxu1 }
 0x27a   : > { %v7600_v36 = vadd.f32 %v12178_v48, %v7516_v56  ;;  %v6690_v6 = vadd.f32 %v6686_v5, %v6144_v39 }
 0x27c   : > { %v7236_v33 = vadd.f32 %v7232_v29, %v6690_v6 }
 0x27e   : > { %v12176_v13 = vpop.f32.mrf.mxu0 }
 0x27f   : > { %v7697_v28 = vadd.f32 %v12176_v13, %v7608_v4 }
 0x280   : > { %v12182_v15 = vpop.f32.mrf.mxu0 }
 0x281   : > { %v12184_v14 = vpop.f32.mrf.mxu1  ;;  %v7691_v22 = vadd.f32 %v12182_v15, %v7600_v36 }
 0x282   : > { %v7778_v13 = vadd.f32 %v12184_v14, %v7697_v28 }
 0x283   : > { %v12190_v7 = vpop.f32.mrf.mxu1 }
 0x284   : > { %v7772_v43 = vadd.f32 %v12190_v7, %v7691_v22  ;;  %v7782_v61 = vadd.f32 %v7778_v13, %v7236_v33 }
 0x288   : > { %v9952_v41 = vpop.f32.mrf.mxu0 }
 0x28a   : > { %v7874_v23 = vpop.f32.mrf.mxu0 }
 0x28b   : > { %v9963_v40 = vpop.f32.mrf.mxu1 }
 0x28c   : > { %v7982_v10 = vadd.f32 %v9963_v40, %v9952_v41  ;;  %v7145_v41 = vadd.f32 %v12310_v26, %v7054_v57  ;;  %v6143_v40 = vadd.f32 %v6134_v24, %v5597_v38 }
 0x28d   : > { %v7975_v31 = vpop.f32.mrf.mxu1 }
 0x28e   : > { %v7976_v63 = vadd.f32 %v7975_v31, %v7874_v23  ;;  %v7226_v20 = vadd.f32 %v12313_v42, %v7145_v41  ;;  %v6689_v50 = vadd.f32 %v6680_v9, %v6143_v40 }
 0x290   : > { %v7235_v21 = vadd.f32 %v7226_v20, %v6689_v50 }
 0x292   : > { %v9974_v45 = vpop.f32.mrf.mxu0  ;;  %v7781_v30 = vadd.f32 %v7772_v43, %v7235_v21 }
 0x293   : > { %v8069_v12 = vadd.f32 %v9974_v45, %v7982_v10 }
 0x294   : > { %v8061_v25 = vpop.f32.mrf.mxu0 }
 0x295   : > { %v9985_v27 = vpop.f32.mrf.mxu1  ;;  %v8062_v60 = vadd.f32 %v8061_v25, %v7976_v63 }
 0x296   : > { %v8154_v23 = vadd.f32 %v9985_v27, %v8069_v12 }
 0x297   : > { %v8145_v18 = vpop.f32.mrf.mxu1 }
 0x298   : > { %v8146_v58 = vadd.f32 %v8145_v18, %v8062_v60 }
 0x29c   : > { %v9996_v48 = vpop.f32.mrf.mxu0 }
 0x29d   : > { %v8243_v44 = vadd.f32 %v9996_v48, %v8154_v23 }
 0x29e   : > { %v8236_v45 = vpop.f32.mrf.mxu0 }
 0x29f   : > { %v8237_v15 = vadd.f32 %v8236_v45, %v8146_v58  ;;  %v10007_v46 = vpop.f32.mrf.mxu1 }
 0x2a0   : > { %v8324_v55 = vadd.f32 %v10007_v46, %v8243_v44 }
 0x2a1   : > { %v8317_v14 = vpop.f32.mrf.mxu1 }
 0x2a2   : > { %v8328_v19 = vadd.f32 %v8324_v55, %v7782_v61  ;;  %v8318_v0 = vadd.f32 %v8317_v14, %v8237_v15 }
 0x2a4   : > { %8331 = vst.msk [vmem:[%s136_s17 + $0x8] sm:$0xff] %vm8329_vm2, %v8328_v19  ;;  %v8327_v7 = vadd.f32 %v8318_v0, %v7781_v30 }
 0x2a6   : > { %8330 = vst.msk [vmem:[%s136_s17] sm:$0xff] %vm8329_vm2, %v8327_v7 }
 0x2a7   : > { %10062 = shalt.err (!%p10059_p3)
}
 0x2a8   : > { %s10063_s30 = scalar_lea.hbm %s12231_s25, 256  ;;  %s10067_s6 = scalar_lea.hbm %s12279_s2, 2048 }
 0x2a9   : > { %p10064_p4 = scmp.ne.s32.totalorder %s12231_s25, %s10063_s30  ;;  %p10068_p9 = scmp.lt.s32.totalorder %s12231_s25, %s12279_s2 }
 0x2aa   : > { %p10069_p10 = scmp.lt.s32.totalorder %s10067_s6, %s10063_s30 }
 0x2ab   : > { %p10065_p7 = pnand %p10064_p4, %p10167_p5 }
 0x2ac   : > { %p10070_p11 = por %p10069_p10, %p10068_p9 }
 0x2ad   : > { %p10066_p8 = pneg %p10065_p7 }
 0x2af   : > { %p10071_p12 = pnand %p10070_p11, %p10066_p8 }
 0x2b1   : > { %10074 = shalt.err (!%p10071_p12)
}
 0x2b2   : > { %s10112_s8 = smov 128   ;;  %s10113_s14 = smov 8  }
 0x2b3   : > { %10008 = dma.vmem_to_hbm [thread:$0]  (%p10167_p5), %s12233_s21, 256, %s12231_s25, %s12237_s13, %s10112_s8, %s10112_s8, %s10113_s14  }
 0x2b4 PF: > { %p10014_p13 = scmp.ge.s32.totalorder %s10109_s12, 2  ;;  %s8361_s16 = sand.u32 1, %s10097_s9  }
 0x2b5   : > { %s8362_s17 = scalar_lea.sflag [#allocation3], %s8361_s16 }
 0x2b6   : > { %p10011_p0 = pnand %p10014_p13, %p10171_p6 }
 0x2b8   : > { %p10012_p1 = pneg %p10011_p0 }
 0x2ba   : > { %10092 = dma.done.wait (%p10012_p1), %s8362_s17, 256  }
 0x2bb   : > { %10094 = vsyncadd (%p10012_p1), %s8362_s17, 4294967040  ;;  %p12_p2 = scmp.ge.s32.totalorder %s10154_s15, 10   ;;  %s12314_s9 = smov %s10101_s10 }
 0x2bc   : > { %s12315_s10 = smov %s10105_s11  ;;  %s12316_s11 = smov %s10165_s18 }
 0x2bd   : > { %s12317_s12 = smov %s10154_s15  ;;  %14 = sbr.rel (!%p12_p2) target bundleno = 3 (0x3), region = 77 }
 0x2c2   :  { %8367 = vsyncpa [#allocation3], 1 }
 0x2c3   :  { %8369 = vsyncpa [#allocation3 + $0x1], 1 }

</bundles_post_ra>
